<compile_context>
chip_gen: v7x
topology: tpu7x:2x2x1
jax: 0.10.0
libtpu: 0.0.40
codegen_flags: <defaults>
</compile_context>

<pallas_src>
import functools

import jax
import jax.numpy as jnp
from jax.experimental import pallas as pl
from jax.experimental.pallas import tpu as pltpu

_LANE = 128


def _mlp_kernel(x_ref,
                w1, b1, w2, b2, w3, b3, w4, b4, w5, b5, w6, b6,
                o_ref):
    """Fused 6-layer MLP (Linear+ReLU x5, final Linear) on one batch tile."""
    dot_dtype = w1.dtype  # bf16 (default) or f32

    def layer(h, w_ref, b_ref, relu):
        # MXU matmul in bf16 with f32 accumulation; bias + ReLU in f32 (VPU).
        y = jnp.dot(h, w_ref[...], preferred_element_type=jnp.float32) + b_ref[...]
        if relu:
            # Round to bf16 here (it would be rounded before the next dot
            # anyway) -> halves live activation bytes / spill traffic.
            return jnp.maximum(y, 0.0).astype(dot_dtype)
        return y

    h = x_ref[...].astype(dot_dtype)
    # encoder: in -> 128 -> 256 -> 512  (ReLU + Dropout(eval)=identity after each)
    h = layer(h, w1, b1, relu=True)
    h = layer(h, w2, b2, relu=True)
    h = layer(h, w3, b3, relu=True)
    # decoder: 512 -> 256 -> 128 -> out (last layer has no ReLU / no dropout)
    h = layer(h, w4, b4, relu=True)
    h = layer(h, w5, b5, relu=True)
    y = layer(h, w6, b6, relu=False)
    o_ref[...] = y.astype(o_ref.dtype)  # bf16 store (halves HBM writeback)


def _pick_batch_tile(batch, requested):
    """Round the requested tile to 128, cap it at the padded batch, and keep
    >= 2 grid steps when the batch allows it (so v7x's two TensorCores both
    get work via the 'parallel' batch axis)."""
    blocks_req = max(1, requested // _LANE)
    blocks_b = pl.cdiv(batch, _LANE)
    blocks = min(blocks_req, blocks_b)
    if blocks_b >= 2 and blocks >= blocks_b:
        blocks = pl.cdiv(blocks_b, 2)
    return blocks * _LANE


def linear_model_with_dropout(x, params, *, batch_tile=512, use_bf16=True,
                              out_dtype=jnp.float32):
    """x: (B, input_size) float32. params: list of (W(in,out), b(1,out)) f32.

    batch_tile is the main tuning knob (default 512; 256 is the practical
    minimum on v6e/v7x so the MXU M dimension is filled).  The batch is
    zero-padded up to a multiple of the chosen tile and the result sliced back.
    """
    B, in_size = x.shape
    out_size = params[-1][0].shape[1]
    comp_dtype = jnp.bfloat16 if use_bf16 else jnp.float32

    bt = _pick_batch_tile(B, batch_tile)
    n_tiles = pl.cdiv(B, bt)
    b_pad = n_tiles * bt
    # No wrapper-side cast of x (kernel casts once); pad only if needed.
    x_p = x if b_pad == B else jnp.pad(x, ((0, b_pad - B), (0, 0)))

    # Pad output features to full 128-lane width (lane-dense stores).
    out_pad = pl.cdiv(out_size, _LANE) * _LANE

    prepped = []
    for idx, (w, b) in enumerate(params):
        if idx == len(params) - 1 and out_pad != out_size:
            w = jnp.pad(w, ((0, 0), (0, out_pad - out_size)))
            b = jnp.pad(b, ((0, 0), (0, out_pad - out_size)))
        prepped.append((w.astype(comp_dtype), b.astype(jnp.float32)))

    flat_args = []
    in_specs = [pl.BlockSpec((bt, in_size), lambda i: (i, 0))]
    for (w, b) in prepped:
        flat_args += [w, b]
        in_specs += [
            pl.BlockSpec(w.shape, lambda i: (0, 0)),  # full weight, VMEM-resident
            pl.BlockSpec(b.shape, lambda i: (0, 0)),  # (1, out) bias, f32
        ]

    out = pl.pallas_call(
        _mlp_kernel,
        out_shape=jax.ShapeDtypeStruct((b_pad, out_pad), comp_dtype),
        grid_spec=pltpu.PrefetchScalarGridSpec(
            num_scalar_prefetch=0,
            grid=(n_tiles,),
            in_specs=in_specs,
            out_specs=pl.BlockSpec((bt, out_pad), lambda i: (i, 0)),
        ),
        compiler_params=pltpu.CompilerParams(
            dimension_semantics=("parallel",),
        ),
    )(x_p, *flat_args)

    return out[:B, :out_size].astype(out_dtype)


def init_params(key, input_size, output_size):
    """PyTorch nn.Linear default init: U(-1/sqrt(fan_in), 1/sqrt(fan_in)).
    Weights stored as (in, out) = PyTorch weight.T."""
    dims = [input_size, 128, 256, 512, 256, 128, output_size]
    params = []
    for i in range(len(dims) - 1):
        fan_in, fan_out = dims[i], dims[i + 1]
        key, kw, kb = jax.random.split(key, 3)
        bound = 1.0 / jnp.sqrt(jnp.float32(fan_in))
        w = jax.random.uniform(kw, (fan_in, fan_out), jnp.float32, -bound, bound)
        b = jax.random.uniform(kb, (1, fan_out), jnp.float32, -bound, bound)
        params.append((w, b))
    return params


def reference_forward(x, params, *, compute_dtype=jnp.float32):
    """Pure-JAX reference. compute_dtype=bfloat16 mirrors the kernel's MXU
    precision (bf16 operands, f32 accumulate, f32 bias/ReLU)."""
    h = x
    n = len(params)
    for i, (w, b) in enumerate(params):
        h = jnp.dot(h.astype(compute_dtype), w.astype(compute_dtype),
                    preferred_element_type=jnp.float32) + b.astype(jnp.float32)
        if i < n - 1:
            h = jnp.maximum(h, 0.0)
    return h


if __name__ == "__main__":
    key = jax.random.PRNGKey(0)
    input_size, output_size = 32, 16
    batch = 16  # small demo batch; wrapper caps the tile to one 128-row block

    kx, kp = jax.random.split(key)
    x = jax.random.normal(kx, (batch, input_size), jnp.float32)
    params = init_params(kp, input_size, output_size)

    run = jax.jit(functools.partial(linear_model_with_dropout,
                                    batch_tile=512, use_bf16=True))
    out = jax.block_until_ready(run(x, params))
    assert out.shape == (batch, output_size)
    assert out.dtype == jnp.float32

    # Check against a reference that mirrors the kernel's bf16-operand /
    # f32-accumulate precision (output is additionally bf16-rounded on store).
    ref_bf16 = reference_forward(x, params, compute_dtype=jnp.bfloat16)
    assert jnp.allclose(out, ref_bf16, atol=2e-2, rtol=2e-2), "mismatch vs bf16 reference"

    # Loose sanity check against the full-f32 reference (bf16 rounding noise only).
    ref_f32 = reference_forward(x, params, compute_dtype=jnp.float32)
    assert float(jnp.max(jnp.abs(out - ref_f32))) < 0.25, "mismatch vs f32 reference"

    print("KERNEL_OK")
</pallas_src>

<mosaic_0001>
module attributes {stable_mosaic.version = 11 : i64} {
  func.func @_mlp_kernel(%arg0: i32, %arg1: memref<128x32xf32, #tpu.memory_space<vmem>>, %arg2: memref<32x128xbf16, #tpu.memory_space<vmem>>, %arg3: memref<1x128xf32, #tpu.memory_space<vmem>>, %arg4: memref<128x256xbf16, #tpu.memory_space<vmem>>, %arg5: memref<1x256xf32, #tpu.memory_space<vmem>>, %arg6: memref<256x512xbf16, #tpu.memory_space<vmem>>, %arg7: memref<1x512xf32, #tpu.memory_space<vmem>>, %arg8: memref<512x256xbf16, #tpu.memory_space<vmem>>, %arg9: memref<1x256xf32, #tpu.memory_space<vmem>>, %arg10: memref<256x128xbf16, #tpu.memory_space<vmem>>, %arg11: memref<1x128xf32, #tpu.memory_space<vmem>>, %arg12: memref<128x128xbf16, #tpu.memory_space<vmem>>, %arg13: memref<1x128xf32, #tpu.memory_space<vmem>>, %arg14: memref<128x128xbf16, #tpu.memory_space<vmem>>) attributes {dimension_semantics = [#tpu.dimension_semantics<parallel>], iteration_bounds = array<i64: 1>, scalar_prefetch = 0 : i64, scratch_operands = 0 : i64, tpu.core_type = #tpu.core_type<tc>, window_params = [{transform_indices = @transform_0, window_bounds = array<i64: 128, 32>}, {pipeline_mode = #tpu.pipeline_mode<synchronous>, transform_indices = @transform_1, window_bounds = array<i64: 32, 128>}, {pipeline_mode = #tpu.pipeline_mode<synchronous>, transform_indices = @transform_2, window_bounds = array<i64: 1, 128>}, {pipeline_mode = #tpu.pipeline_mode<synchronous>, transform_indices = @transform_3, window_bounds = array<i64: 128, 256>}, {pipeline_mode = #tpu.pipeline_mode<synchronous>, transform_indices = @transform_4, window_bounds = array<i64: 1, 256>}, {pipeline_mode = #tpu.pipeline_mode<synchronous>, transform_indices = @transform_5, window_bounds = array<i64: 256, 512>}, {pipeline_mode = #tpu.pipeline_mode<synchronous>, transform_indices = @transform_6, window_bounds = array<i64: 1, 512>}, {pipeline_mode = #tpu.pipeline_mode<synchronous>, transform_indices = @transform_7, window_bounds = array<i64: 512, 256>}, {pipeline_mode = #tpu.pipeline_mode<synchronous>, transform_indices = @transform_8, window_bounds = array<i64: 1, 256>}, {pipeline_mode = #tpu.pipeline_mode<synchronous>, transform_indices = @transform_9, window_bounds = array<i64: 256, 128>}, {pipeline_mode = #tpu.pipeline_mode<synchronous>, transform_indices = @transform_10, window_bounds = array<i64: 1, 128>}, {pipeline_mode = #tpu.pipeline_mode<synchronous>, transform_indices = @transform_11, window_bounds = array<i64: 128, 128>}, {pipeline_mode = #tpu.pipeline_mode<synchronous>, transform_indices = @transform_12, window_bounds = array<i64: 1, 128>}, {transform_indices = @transform_13, window_bounds = array<i64: 128, 128>}]} {
    %c0 = arith.constant 0 : index
    %c0_0 = arith.constant 0 : index
    %0 = vector.load %arg1[%c0, %c0_0] : memref<128x32xf32, #tpu.memory_space<vmem>>, vector<128x32xf32>
    %1 = arith.truncf %0 : vector<128x32xf32> to vector<128x32xbf16>
    %c0_1 = arith.constant 0 : index
    %c0_2 = arith.constant 0 : index
    %2 = vector.load %arg2[%c0_1, %c0_2] : memref<32x128xbf16, #tpu.memory_space<vmem>>, vector<32x128xbf16>
    %cst = arith.constant dense<0.000000e+00> : vector<128x128xf32>
    %3 = tpu.matmul %1, %2, %cst {dimension_numbers = #tpu.dot_dimension_numbers<[1], [0], [0], [1], [0, 0, 1, 1], [], []>} : vector<128x32xbf16>, vector<32x128xbf16>, vector<128x128xf32> -> vector<128x128xf32>
    %c0_3 = arith.constant 0 : index
    %c0_4 = arith.constant 0 : index
    %4 = vector.load %arg3[%c0_3, %c0_4] : memref<1x128xf32, #tpu.memory_space<vmem>>, vector<1x128xf32>
    %5 = vector.broadcast %4 : vector<1x128xf32> to vector<128x128xf32>
    %6 = arith.addf %3, %5 : vector<128x128xf32>
    %cst_5 = arith.constant 0.000000e+00 : f32
    %7 = vector.broadcast %cst_5 : f32 to vector<128x128xf32>
    %8 = arith.maximumf %6, %7 : vector<128x128xf32>
    %9 = arith.truncf %8 : vector<128x128xf32> to vector<128x128xbf16>
    %c0_6 = arith.constant 0 : index
    %c0_7 = arith.constant 0 : index
    %10 = vector.load %arg4[%c0_6, %c0_7] : memref<128x256xbf16, #tpu.memory_space<vmem>>, vector<128x256xbf16>
    %cst_8 = arith.constant dense<0.000000e+00> : vector<128x256xf32>
    %11 = tpu.matmul %9, %10, %cst_8 {dimension_numbers = #tpu.dot_dimension_numbers<[1], [0], [0], [1], [0, 0, 1, 1], [], []>} : vector<128x128xbf16>, vector<128x256xbf16>, vector<128x256xf32> -> vector<128x256xf32>
    %c0_9 = arith.constant 0 : index
    %c0_10 = arith.constant 0 : index
    %12 = vector.load %arg5[%c0_9, %c0_10] : memref<1x256xf32, #tpu.memory_space<vmem>>, vector<1x256xf32>
    %13 = vector.broadcast %12 : vector<1x256xf32> to vector<128x256xf32>
    %14 = arith.addf %11, %13 : vector<128x256xf32>
    %cst_11 = arith.constant 0.000000e+00 : f32
    %15 = vector.broadcast %cst_11 : f32 to vector<128x256xf32>
    %16 = arith.maximumf %14, %15 : vector<128x256xf32>
    %17 = arith.truncf %16 : vector<128x256xf32> to vector<128x256xbf16>
    %c0_12 = arith.constant 0 : index
    %c0_13 = arith.constant 0 : index
    %18 = vector.load %arg6[%c0_12, %c0_13] : memref<256x512xbf16, #tpu.memory_space<vmem>>, vector<256x512xbf16>
    %cst_14 = arith.constant dense<0.000000e+00> : vector<128x512xf32>
    %19 = tpu.matmul %17, %18, %cst_14 {dimension_numbers = #tpu.dot_dimension_numbers<[1], [0], [0], [1], [0, 0, 1, 1], [], []>} : vector<128x256xbf16>, vector<256x512xbf16>, vector<128x512xf32> -> vector<128x512xf32>
    %c0_15 = arith.constant 0 : index
    %c0_16 = arith.constant 0 : index
    %20 = vector.load %arg7[%c0_15, %c0_16] : memref<1x512xf32, #tpu.memory_space<vmem>>, vector<1x512xf32>
    %21 = vector.broadcast %20 : vector<1x512xf32> to vector<128x512xf32>
    %22 = arith.addf %19, %21 : vector<128x512xf32>
    %cst_17 = arith.constant 0.000000e+00 : f32
    %23 = vector.broadcast %cst_17 : f32 to vector<128x512xf32>
    %24 = arith.maximumf %22, %23 : vector<128x512xf32>
    %25 = arith.truncf %24 : vector<128x512xf32> to vector<128x512xbf16>
    %c0_18 = arith.constant 0 : index
    %c0_19 = arith.constant 0 : index
    %26 = vector.load %arg8[%c0_18, %c0_19] : memref<512x256xbf16, #tpu.memory_space<vmem>>, vector<512x256xbf16>
    %cst_20 = arith.constant dense<0.000000e+00> : vector<128x256xf32>
    %27 = tpu.matmul %25, %26, %cst_20 {dimension_numbers = #tpu.dot_dimension_numbers<[1], [0], [0], [1], [0, 0, 1, 1], [], []>} : vector<128x512xbf16>, vector<512x256xbf16>, vector<128x256xf32> -> vector<128x256xf32>
    %c0_21 = arith.constant 0 : index
    %c0_22 = arith.constant 0 : index
    %28 = vector.load %arg9[%c0_21, %c0_22] : memref<1x256xf32, #tpu.memory_space<vmem>>, vector<1x256xf32>
    %29 = vector.broadcast %28 : vector<1x256xf32> to vector<128x256xf32>
    %30 = arith.addf %27, %29 : vector<128x256xf32>
    %cst_23 = arith.constant 0.000000e+00 : f32
    %31 = vector.broadcast %cst_23 : f32 to vector<128x256xf32>
    %32 = arith.maximumf %30, %31 : vector<128x256xf32>
    %33 = arith.truncf %32 : vector<128x256xf32> to vector<128x256xbf16>
    %c0_24 = arith.constant 0 : index
    %c0_25 = arith.constant 0 : index
    %34 = vector.load %arg10[%c0_24, %c0_25] : memref<256x128xbf16, #tpu.memory_space<vmem>>, vector<256x128xbf16>
    %cst_26 = arith.constant dense<0.000000e+00> : vector<128x128xf32>
    %35 = tpu.matmul %33, %34, %cst_26 {dimension_numbers = #tpu.dot_dimension_numbers<[1], [0], [0], [1], [0, 0, 1, 1], [], []>} : vector<128x256xbf16>, vector<256x128xbf16>, vector<128x128xf32> -> vector<128x128xf32>
    %c0_27 = arith.constant 0 : index
    %c0_28 = arith.constant 0 : index
    %36 = vector.load %arg11[%c0_27, %c0_28] : memref<1x128xf32, #tpu.memory_space<vmem>>, vector<1x128xf32>
    %37 = vector.broadcast %36 : vector<1x128xf32> to vector<128x128xf32>
    %38 = arith.addf %35, %37 : vector<128x128xf32>
    %cst_29 = arith.constant 0.000000e+00 : f32
    %39 = vector.broadcast %cst_29 : f32 to vector<128x128xf32>
    %40 = arith.maximumf %38, %39 : vector<128x128xf32>
    %41 = arith.truncf %40 : vector<128x128xf32> to vector<128x128xbf16>
    %c0_30 = arith.constant 0 : index
    %c0_31 = arith.constant 0 : index
    %42 = vector.load %arg12[%c0_30, %c0_31] : memref<128x128xbf16, #tpu.memory_space<vmem>>, vector<128x128xbf16>
    %cst_32 = arith.constant dense<0.000000e+00> : vector<128x128xf32>
    %43 = tpu.matmul %41, %42, %cst_32 {dimension_numbers = #tpu.dot_dimension_numbers<[1], [0], [0], [1], [0, 0, 1, 1], [], []>} : vector<128x128xbf16>, vector<128x128xbf16>, vector<128x128xf32> -> vector<128x128xf32>
    %c0_33 = arith.constant 0 : index
    %c0_34 = arith.constant 0 : index
    %44 = vector.load %arg13[%c0_33, %c0_34] : memref<1x128xf32, #tpu.memory_space<vmem>>, vector<1x128xf32>
    %45 = vector.broadcast %44 : vector<1x128xf32> to vector<128x128xf32>
    %46 = arith.addf %43, %45 : vector<128x128xf32>
    %47 = arith.truncf %46 : vector<128x128xf32> to vector<128x128xbf16>
    %c0_35 = arith.constant 0 : index
    %c0_36 = arith.constant 0 : index
    %48 = vector.load %arg14[%c0_35, %c0_36] : memref<128x128xbf16, #tpu.memory_space<vmem>>, vector<128x128xbf16>
    tpu.vector_store %arg14[%c0_35, %c0_36], %47 {strides = array<i32>} : memref<128x128xbf16, #tpu.memory_space<vmem>>, vector<128x128xbf16>,
    return
  }
  func.func @transform_0(%arg0: i32) -> (i32, i32) {
    %c0_i32 = arith.constant 0 : i32
    %c0_i32_0 = arith.constant 0 : i32
    return %arg0, %c0_i32 : i32, i32
  }
  func.func @transform_1(%arg0: i32) -> (i32, i32) {
    %c0_i32 = arith.constant 0 : i32
    %c0_i32_0 = arith.constant 0 : i32
    %c0_i32_1 = arith.constant 0 : i32
    return %c0_i32, %c0_i32_0 : i32, i32
  }
  func.func @transform_2(%arg0: i32) -> (i32, i32) {
    %c0_i32 = arith.constant 0 : i32
    %c0_i32_0 = arith.constant 0 : i32
    %c0_i32_1 = arith.constant 0 : i32
    return %c0_i32, %c0_i32_0 : i32, i32
  }
  func.func @transform_3(%arg0: i32) -> (i32, i32) {
    %c0_i32 = arith.constant 0 : i32
    %c0_i32_0 = arith.constant 0 : i32
    %c0_i32_1 = arith.constant 0 : i32
    return %c0_i32, %c0_i32_0 : i32, i32
  }
  func.func @transform_4(%arg0: i32) -> (i32, i32) {
    %c0_i32 = arith.constant 0 : i32
    %c0_i32_0 = arith.constant 0 : i32
    %c0_i32_1 = arith.constant 0 : i32
    return %c0_i32, %c0_i32_0 : i32, i32
  }
  func.func @transform_5(%arg0: i32) -> (i32, i32) {
    %c0_i32 = arith.constant 0 : i32
    %c0_i32_0 = arith.constant 0 : i32
    %c0_i32_1 = arith.constant 0 : i32
    return %c0_i32, %c0_i32_0 : i32, i32
  }
  func.func @transform_6(%arg0: i32) -> (i32, i32) {
    %c0_i32 = arith.constant 0 : i32
    %c0_i32_0 = arith.constant 0 : i32
    %c0_i32_1 = arith.constant 0 : i32
    return %c0_i32, %c0_i32_0 : i32, i32
  }
  func.func @transform_7(%arg0: i32) -> (i32, i32) {
    %c0_i32 = arith.constant 0 : i32
    %c0_i32_0 = arith.constant 0 : i32
    %c0_i32_1 = arith.constant 0 : i32
    return %c0_i32, %c0_i32_0 : i32, i32
  }
  func.func @transform_8(%arg0: i32) -> (i32, i32) {
    %c0_i32 = arith.constant 0 : i32
    %c0_i32_0 = arith.constant 0 : i32
    %c0_i32_1 = arith.constant 0 : i32
    return %c0_i32, %c0_i32_0 : i32, i32
  }
  func.func @transform_9(%arg0: i32) -> (i32, i32) {
    %c0_i32 = arith.constant 0 : i32
    %c0_i32_0 = arith.constant 0 : i32
    %c0_i32_1 = arith.constant 0 : i32
    return %c0_i32, %c0_i32_0 : i32, i32
  }
  func.func @transform_10(%arg0: i32) -> (i32, i32) {
    %c0_i32 = arith.constant 0 : i32
    %c0_i32_0 = arith.constant 0 : i32
    %c0_i32_1 = arith.constant 0 : i32
    return %c0_i32, %c0_i32_0 : i32, i32
  }
  func.func @transform_11(%arg0: i32) -> (i32, i32) {
    %c0_i32 = arith.constant 0 : i32
    %c0_i32_0 = arith.constant 0 : i32
    %c0_i32_1 = arith.constant 0 : i32
    return %c0_i32, %c0_i32_0 : i32, i32
  }
  func.func @transform_12(%arg0: i32) -> (i32, i32) {
    %c0_i32 = arith.constant 0 : i32
    %c0_i32_0 = arith.constant 0 : i32
    %c0_i32_1 = arith.constant 0 : i32
    return %c0_i32, %c0_i32_0 : i32, i32
  }
  func.func @transform_13(%arg0: i32) -> (i32, i32) {
    %c0_i32 = arith.constant 0 : i32
    %c0_i32_0 = arith.constant 0 : i32
    return %arg0, %c0_i32 : i32, i32
  }
}

</mosaic_0001>

<bundles_post_ra>
// kernel: linear_model_with_dropout.1
= control target key start
LH: loop header
LB: loop body
LE: loop exit
PB: predicated region body
PF: predicated region fallthrough
CT: control target
= control target key end

     0   :  { %vm92_vm0 = vcmask 261120   ;;  %v3122_v42 = vmov 0   ;;  %s4044_s1 = inlined_call_operand.vmem [shape: bf16[32,128], index: 1, kind: input, shape index: {}]   ;;  %s4045_s0 = inlined_call_operand.vmem [shape: f32[128,32], index: 0, kind: input, shape index: {}]   ;;  %s4046_s3 = inlined_call_operand.vmem [shape: bf16[128,256], index: 3, kind: input, shape index: {}]   ;;  %s4047_s5 = inlined_call_operand.vmem [shape: bf16[256,512], index: 5, kind: input, shape index: {}]   ;;  %s4048_s2 = inlined_call_operand.vmem [shape: f32[1,128], index: 2, kind: input, shape index: {}]   ;;  %s4049_s7 = inlined_call_operand.vmem [shape: bf16[512,256], index: 7, kind: input, shape index: {}]   ;;  %s4050_s4 = inlined_call_operand.vmem [shape: f32[1,256], index: 4, kind: input, shape index: {}]   ;;  %s4051_s6 = inlined_call_operand.vmem [shape: f32[1,512], index: 6, kind: input, shape index: {}]   ;;  %s4052_s9 = inlined_call_operand.vmem [shape: bf16[256,128], index: 9, kind: input, shape index: {}]   ;;  %s4053_s11 = inlined_call_operand.vmem [shape: bf16[128,128], index: 11, kind: input, shape index: {}]   ;;  %s4054_s8 = inlined_call_operand.vmem [shape: f32[1,256], index: 8, kind: input, shape index: {}]   ;;  %s4055_s10 = inlined_call_operand.vmem [shape: f32[1,128], index: 10, kind: input, shape index: {}]   ;;  %s4056_s12 = inlined_call_operand.vmem [shape: f32[1,128], index: 12, kind: input, shape index: {}]   ;;  %s4057_s13 = inlined_call_operand.vmem [shape: bf16[128,128], index: 13, kind: output, shape index: {}]  }
   0x1   :  { %v2880_v0 = vld [vmem:[%s4044_s1] sm:$0xff]   ;;  %v2881_v1 = vld [vmem:[%s4044_s1 + $0x8] sm:$0xff]   ;;  %v47_v5 = vld [vmem:[%s4045_s0 + $0x10] sm:$0xff]  ;;  %378 = vmatprep.mubr.bf16.mxu1 %v3122_v42 }
   0x2   :  { %2763 = vmatprep.subr.bf16.mxu0 %v2880_v0  ;;  %v45_v2 = vld [vmem:[%s4045_s0] sm:$0xff]  ;;  %v46_v3 = vld [vmem:[%s4045_s0 + $0x8] sm:$0xff]  ;;  %v48_v6 = vld [vmem:[%s4045_s0 + $0x18] sm:$0xff] }
   0x3   :  { %2764 = vmatpush3.bf16.msra.mxu0 %v2880_v0  ;;  %v61_v4 = vpack.c.bf16 %v46_v3, %v45_v2  ;;  %v49_v7 = vld [vmem:[%s4045_s0 + $0x20] sm:$0xff]  ;;  %v50_v8 = vld [vmem:[%s4045_s0 + $0x28] sm:$0xff]  ;;  %v62_v9 = vpack.c.bf16 %v48_v6, %v47_v5  ;;  %v51_v13 = vld [vmem:[%s4045_s0 + $0x30] sm:$0xff] }
   0x4   :  { %2765 = vmatprep.subr.bf16.mxu0 %v2881_v1  ;;  %v63_v10 = vpack.c.bf16 %v50_v8, %v49_v7  ;;  %v2882_v11 = vld [vmem:[%s4046_s3 + $0x4] ss:$8 sps:$4 sm:$0xff]   ;;  %v2884_v12 = vld [vmem:[%s4046_s3] ss:$8 sps:$4 sm:$0xff]   ;;  %v52_v14 = vld [vmem:[%s4045_s0 + $0x38] sm:$0xff] }
   0x5   :  { %2767 = vmatprep.mubr.msk.bf16.mxu0 %vm92_vm0, %v61_v4  ;;  %v2885_v15 = vld [vmem:[%s4046_s3 + $0x14] ss:$8 sps:$4 sm:$0xff]   ;;  %v53_v16 = vld [vmem:[%s4045_s0 + $0x40] sm:$0xff]  ;;  %346 = vmatprep.subr.bf16.mxu1 %v2882_v11  ;;  %v2887_v17 = vld [vmem:[%s4046_s3 + $0x10] ss:$8 sps:$4 sm:$0xff]   ;;  %v64_v20 = vpack.c.bf16 %v52_v14, %v51_v13 }
   0x6   :  { %347 = vmatpush1.bf16.msra.mxu1 %v2884_v12  ;;  %v54_v18 = vld [vmem:[%s4045_s0 + $0x48] sm:$0xff]  ;;  %v2891_v23 = vld [vmem:[%s4046_s3 + $0x34] ss:$8 sps:$4 sm:$0xff]   ;;  %v2893_v26 = vld [vmem:[%s4046_s3 + $0x30] ss:$8 sps:$4 sm:$0xff]  }
   0x7   :  { %2766 = vmatpush3.bf16.msra.mxu0 %v2881_v1  ;;  %348 = vmatprep.subr.bf16.mxu1 %v2885_v15  ;;  %v2888_v19 = vld [vmem:[%s4046_s3 + $0x24] ss:$8 sps:$4 sm:$0xff]   ;;  %v65_v21 = vpack.c.bf16 %v54_v18, %v53_v16  ;;  %v2890_v22 = vld [vmem:[%s4046_s3 + $0x20] ss:$8 sps:$4 sm:$0xff]   ;;  %v55_v24 = vld [vmem:[%s4045_s0 + $0x50] sm:$0xff] }
   0x8   :  { %v56_v25 = vld [vmem:[%s4045_s0 + $0x58] sm:$0xff]  ;;  %v57_v27 = vld [vmem:[%s4045_s0 + $0x60] sm:$0xff]  ;;  %v58_v28 = vld [vmem:[%s4045_s0 + $0x68] sm:$0xff] }
   0x9   :  { %v2894_v29 = vld [vmem:[%s4046_s3 + $0x44] ss:$8 sps:$4 sm:$0xff]   ;;  %v66_v30 = vpack.c.bf16 %v56_v25, %v55_v24  ;;  %v67_v31 = vpack.c.bf16 %v58_v28, %v57_v27  ;;  %v2896_v32 = vld [vmem:[%s4046_s3 + $0x40] ss:$8 sps:$4 sm:$0xff]   ;;  %v2897_v33 = vld [vmem:[%s4046_s3 + $0x54] ss:$8 sps:$4 sm:$0xff]  }
   0xa   :  { %2768 = vmatmul.mubr.msk.bf16.vlgmr.msra.gmra.mrb[0].mxu0 %vm92_vm0, %v62_v9  ;;  %349 = vmatpush1.bf16.msra.mxu1 %v2887_v17  ;;  %v59_v34 = vld [vmem:[%s4045_s0 + $0x70] sm:$0xff]  ;;  %v60_v35 = vld [vmem:[%s4045_s0 + $0x78] sm:$0xff]  ;;  %v2900_v38 = vld [vmem:[%s4046_s3 + $0x64] ss:$8 sps:$4 sm:$0xff]  }
   0xb   :  { %2771 = vmatprep.mubr.msk.bf16.mxu0 %vm92_vm0, %v63_v10  ;;  %350 = vmatprep.subr.bf16.mxu1 %v2888_v19  ;;  %v2899_v36 = vld [vmem:[%s4046_s3 + $0x50] ss:$8 sps:$4 sm:$0xff]   ;;  %v68_v37 = vpack.c.bf16 %v60_v35, %v59_v34  ;;  %v2902_v39 = vld [vmem:[%s4046_s3 + $0x60] ss:$8 sps:$4 sm:$0xff]   ;;  %v2903_v40 = vld [vmem:[%s4046_s3 + $0x74] ss:$8 sps:$4 sm:$0xff]  }
   0xc   :  { %v2905_v41 = vld [vmem:[%s4046_s3 + $0x70] ss:$8 sps:$4 sm:$0xff]   ;;  %v2908_v44 = vld [vmem:[%s4047_s5 + $0x4] ss:$16 sps:$4 sm:$0xff]   ;;  %v2911_v45 = vld [vmem:[%s4047_s5 + $0xc] ss:$16 sps:$4 sm:$0xff]  }
   0xd   :  { %v2906_v43 = vld [vmem:[%s4047_s5] ss:$16 sps:$4 sm:$0xff]   ;;  %913 = vmatprep.subr.bf16.mxu0 %v2908_v44  ;;  %v2914_v46 = vld [vmem:[%s4047_s5 + $0x24] ss:$16 sps:$4 sm:$0xff]   ;;  %v2917_v25 = vld [vmem:[%s4047_s5 + $0x2c] ss:$16 sps:$4 sm:$0xff]  }
   0xe   :  { %351 = vmatpush1.bf16.msra.mxu1 %v2890_v22  ;;  %914 = vmatpush1.bf16.msra.mxu0 %v2906_v43  ;;  %v2912_v47 = vld [vmem:[%s4047_s5 + $0x20] ss:$16 sps:$4 sm:$0xff]   ;;  %v2920_v48 = vld [vmem:[%s4047_s5 + $0x44] ss:$16 sps:$4 sm:$0xff]   ;;  %v2909_v22 = vld [vmem:[%s4047_s5 + $0x8] ss:$16 sps:$4 sm:$0xff]  }
   0xf   :  { %352 = vmatprep.subr.bf16.mxu1 %v2891_v23  ;;  %915 = vmatprep.subr.bf16.mxu0 %v2914_v46  ;;  %v2918_v49 = vld [vmem:[%s4047_s5 + $0x40] ss:$16 sps:$4 sm:$0xff]   ;;  %v2926_v50 = vld [vmem:[%s4047_s5 + $0x64] ss:$16 sps:$4 sm:$0xff]   ;;  %v2929_v44 = vld [vmem:[%s4047_s5 + $0x6c] ss:$16 sps:$4 sm:$0xff]  }
  0x10   :  { %v2924_v51 = vld [vmem:[%s4047_s5 + $0x60] ss:$16 sps:$4 sm:$0xff]   ;;  %v2932_v52 = vld [vmem:[%s4047_s5 + $0x84] ss:$16 sps:$4 sm:$0xff]  }
  0x11   :  { %v2930_v53 = vld [vmem:[%s4047_s5 + $0x80] ss:$16 sps:$4 sm:$0xff]   ;;  %v2938_v54 = vld [vmem:[%s4047_s5 + $0xa4] ss:$16 sps:$4 sm:$0xff]  }
  0x12   :  { %2772 = vmatmul.mubr.msk.bf16.gmra.mrb[4].mxu0 %vm92_vm0, %v64_v20  ;;  %353 = vmatpush1.bf16.msra.mxu1 %v2893_v26  ;;  %v2936_v55 = vld [vmem:[%s4047_s5 + $0xa0] ss:$16 sps:$4 sm:$0xff]   ;;  %v2944_v56 = vld [vmem:[%s4047_s5 + $0xc4] ss:$16 sps:$4 sm:$0xff]  }
  0x13   :  { %2775 = vmatprep.mubr.msk.bf16.mxu0 %vm92_vm0, %v65_v21  ;;  %354 = vmatprep.subr.bf16.mxu1 %v2894_v29  ;;  %v2942_v57 = vld [vmem:[%s4047_s5 + $0xc0] ss:$16 sps:$4 sm:$0xff]   ;;  %v2950_v58 = vld [vmem:[%s4047_s5 + $0xe4] ss:$16 sps:$4 sm:$0xff]  }
  0x14   :  { %916 = vmatpush1.bf16.msra.mxu0 %v2912_v47  ;;  %v2948_v59 = vld [vmem:[%s4047_s5 + $0xe0] ss:$16 sps:$4 sm:$0xff]   ;;  %v2956_v60 = vld [vmem:[%s4047_s5 + $0x104] ss:$16 sps:$4 sm:$0xff]  }
  0x15   :  { %917 = vmatprep.subr.bf16.mxu0 %v2920_v48  ;;  %v2954_v61 = vld [vmem:[%s4047_s5 + $0x100] ss:$16 sps:$4 sm:$0xff]   ;;  %v2962_v62 = vld [vmem:[%s4047_s5 + $0x124] ss:$16 sps:$4 sm:$0xff]  }
  0x16   :  { %355 = vmatpush1.bf16.msra.mxu1 %v2896_v32  ;;  %v2960_v63 = vld [vmem:[%s4047_s5 + $0x120] ss:$16 sps:$4 sm:$0xff]   ;;  %v2968_v0 = vld [vmem:[%s4047_s5 + $0x144] ss:$16 sps:$4 sm:$0xff]  }
  0x17   :  { %356 = vmatprep.subr.bf16.mxu1 %v2897_v33  ;;  %v2966_v1 = vld [vmem:[%s4047_s5 + $0x140] ss:$16 sps:$4 sm:$0xff]   ;;  %v2974_v2 = vld [vmem:[%s4047_s5 + $0x164] ss:$16 sps:$4 sm:$0xff]   ;;  %v2915_v33 = vld [vmem:[%s4047_s5 + $0x28] ss:$16 sps:$4 sm:$0xff]  }
  0x18   :  { %918 = vmatpush1.bf16.msra.mxu0 %v2918_v49  ;;  %v2972_v3 = vld [vmem:[%s4047_s5 + $0x160] ss:$16 sps:$4 sm:$0xff]   ;;  %v2980_v4 = vld [vmem:[%s4047_s5 + $0x184] ss:$16 sps:$4 sm:$0xff]  }
  0x19   :  { %919 = vmatprep.subr.bf16.mxu0 %v2926_v50  ;;  %v2978_v5 = vld [vmem:[%s4047_s5 + $0x180] ss:$16 sps:$4 sm:$0xff]   ;;  %v2986_v6 = vld [vmem:[%s4047_s5 + $0x1a4] ss:$16 sps:$4 sm:$0xff]  }
  0x1a   :  { %2776 = vmatmul.mubr.msk.bf16.gmra.mrb[8].mxu0 %vm92_vm0, %v66_v30  ;;  %357 = vmatpush1.bf16.msra.mxu1 %v2899_v36  ;;  %v2984_v7 = vld [vmem:[%s4047_s5 + $0x1a0] ss:$16 sps:$4 sm:$0xff]   ;;  %v2923_v36 = vld [vmem:[%s4047_s5 + $0x4c] ss:$16 sps:$4 sm:$0xff]  }
  0x1b   :  { %2779 = vmatprep.mubr.msk.bf16.mxu0 %vm92_vm0, %v67_v31  ;;  %358 = vmatprep.subr.bf16.mxu1 %v2900_v38  ;;  %v3394_v8 = vld [vmem:[%s4048_s2] ss:$0 sm:$0xff] }
  0x1c   :  { %920 = vmatpush1.bf16.msra.mxu0 %v2924_v51 }
  0x1d   :  { %921 = vmatprep.subr.bf16.mxu0 %v2932_v52  ;;  %v2927_v52 = vld [vmem:[%s4047_s5 + $0x68] ss:$16 sps:$4 sm:$0xff]  }
  0x1e   :  { %359 = vmatpush1.bf16.msra.mxu1 %v2902_v39 }
  0x1f   :  { %360 = vmatprep.subr.bf16.mxu1 %v2903_v40  ;;  %v2921_v40 = vld [vmem:[%s4047_s5 + $0x48] ss:$16 sps:$4 sm:$0xff]  }
  0x20   :  { %922 = vmatpush1.bf16.msra.mxu0 %v2930_v53 }
  0x21   :  { %923 = vmatprep.subr.bf16.mxu0 %v2938_v54 }
  0x22   :  { %2780 = vmatmul.mubr.msk.bf16.gmra.mrb[12].mxu0 %vm92_vm0, %v68_v37  ;;  %361 = vmatpush1.bf16.msra.mxu1 %v2905_v41 }
  0x23   :  { %1026 = vmatprep.subr.bf16.mxu1 %v2911_v45 }
  0x24   :  { %924 = vmatpush1.bf16.msra.mxu0 %v2936_v55  ;;  %v2935_v55 = vld [vmem:[%s4047_s5 + $0x8c] ss:$16 sps:$4 sm:$0xff]  }
  0x25   :  { %925 = vmatprep.subr.bf16.mxu0 %v2944_v56 }
  0x28   :  { %926 = vmatpush1.bf16.msra.mxu0 %v2942_v57 }
  0x29   :  { %927 = vmatprep.subr.bf16.mxu0 %v2950_v58 }
  0x2c   :  { %928 = vmatpush1.bf16.msra.mxu0 %v2948_v59  ;;  %v2933_v59 = vld [vmem:[%s4047_s5 + $0x88] ss:$16 sps:$4 sm:$0xff]  }
  0x2d   :  { %929 = vmatprep.subr.bf16.mxu0 %v2956_v60 }
  0x30   :  { %930 = vmatpush1.bf16.msra.mxu0 %v2954_v61 }
  0x31   :  { %931 = vmatprep.subr.bf16.mxu0 %v2962_v62  ;;  %v2941_v62 = vld [vmem:[%s4047_s5 + $0xac] ss:$16 sps:$4 sm:$0xff]  }
  0x34   :  { %932 = vmatpush1.bf16.msra.mxu0 %v2960_v63 }
  0x35   :  { %933 = vmatprep.subr.bf16.mxu0 %v2968_v0 }
  0x38   :  { %934 = vmatpush1.bf16.msra.mxu0 %v2966_v1 }
  0x39   :  { %935 = vmatprep.subr.bf16.mxu0 %v2974_v2 }
  0x3c   :  { %936 = vmatpush1.bf16.msra.mxu0 %v2972_v3 }
  0x3d   :  { %937 = vmatprep.subr.bf16.mxu0 %v2980_v4 }
  0x40   :  { %938 = vmatpush1.bf16.msra.mxu0 %v2978_v5 }
  0x41   :  { %939 = vmatprep.subr.bf16.mxu0 %v2986_v6  ;;  %v2939_v6 = vld [vmem:[%s4047_s5 + $0xa8] ss:$16 sps:$4 sm:$0xff]  }
  0x44   :  { %940 = vmatpush1.bf16.msra.mxu0 %v2984_v7 }
  0xdd   :  { %v2769_v9 = vpop.f32.mrb[0].mxu0 }
  0xde   :  { %v160_v10 = vadd.f32 %v2769_v9, %v3394_v8  ;;  %v151_v11 = vpop.f32.mrb[1].mxu0 }
  0xdf   :  { %v152_v12 = vadd.f32 %v3394_v8, %v151_v11  ;;  %v2770_v13 = vpop.f32.mrb[2].mxu0 }
  0xe0   :  { %v163_v14 = vadd.f32 %v2770_v13, %v3394_v8  ;;  %v154_v15 = vpop.f32.mrb[3].mxu0  ;;  %v216_v17 = vmax.f32 %v160_v10, 0.0  ;;  %v2947_v10 = vld [vmem:[%s4047_s5 + $0xcc] ss:$16 sps:$4 sm:$0xff]  }
  0xe1   :  { %v155_v16 = vadd.f32 %v3394_v8, %v154_v15  ;;  %v214_v19 = vmax.f32 %v152_v12, 0.0 }
  0xe2   :  { %v217_v18 = vmax.f32 %v163_v14, 0.0  ;;  %v2945_v14 = vld [vmem:[%s4047_s5 + $0xc8] ss:$16 sps:$4 sm:$0xff]  }
  0xe3   :  { %v215_v20 = vmax.f32 %v155_v16, 0.0  ;;  %v2953_v16 = vld [vmem:[%s4047_s5 + $0xec] ss:$16 sps:$4 sm:$0xff]  }
  0xe4   :  { %v231_v21 = vpack.c.bf16 %v217_v18, %v216_v17  ;;  %v2959_v17 = vld [vmem:[%s4047_s5 + $0x10c] ss:$16 sps:$4 sm:$0xff]   ;;  %v2957_v18 = vld [vmem:[%s4047_s5 + $0x108] ss:$16 sps:$4 sm:$0xff]  }
  0xe5   :  { %v230_v23 = vpack.c.bf16 %v215_v20, %v214_v19  ;;  %v2773_v24 = vpop.f32.mrb[4].mxu0  ;;  %v2965_v19 = vld [vmem:[%s4047_s5 + $0x12c] ss:$16 sps:$4 sm:$0xff]   ;;  %v2963_v20 = vld [vmem:[%s4047_s5 + $0x128] ss:$16 sps:$4 sm:$0xff]  }
  0xe6   :  { %v176_v26 = vadd.f32 %v2773_v24, %v3394_v8  ;;  %v167_v27 = vpop.f32.mrb[5].mxu0  ;;  %v2975_v24 = vld [vmem:[%s4047_s5 + $0x168] ss:$16 sps:$4 sm:$0xff]  }
  0xe7   :  { %379 = vmatmul.mubr.bf16.vlgmr.msra.gmra.mrb[0].mxu1 %v230_v23  ;;  %v168_v28 = vadd.f32 %v3394_v8, %v167_v27  ;;  %v2774_v29 = vpop.f32.mrb[6].mxu0  ;;  %v2977_v23 = vld [vmem:[%s4047_s5 + $0x16c] ss:$16 sps:$4 sm:$0xff]  }
  0xe8   :  { %v220_v30 = vmax.f32 %v176_v26, 0.0  ;;  %v179_v31 = vadd.f32 %v2774_v29, %v3394_v8  ;;  %v170_v32 = vpop.f32.mrb[7].mxu0  ;;  %388 = vmatprep.mubr.bf16.mxu1 %v3122_v42  ;;  %1027 = vmatpush1.bf16.msra.mxu1 %v2909_v22  ;;  %v2969_v22 = vld [vmem:[%s4047_s5 + $0x148] ss:$16 sps:$4 sm:$0xff]   ;;  %v2989_v27 = vld [vmem:[%s4047_s5 + $0x1ac] ss:$16 sps:$4 sm:$0xff]  }
  0xe9   :  { %v218_v34 = vmax.f32 %v168_v28, 0.0  ;;  %v171_v35 = vadd.f32 %v3394_v8, %v170_v32  ;;  %1028 = vmatprep.subr.bf16.mxu1 %v2917_v25  ;;  %v2983_v25 = vld [vmem:[%s4047_s5 + $0x18c] ss:$16 sps:$4 sm:$0xff]   ;;  %v2981_v26 = vld [vmem:[%s4047_s5 + $0x188] ss:$16 sps:$4 sm:$0xff]  }
  0xea   :  { %v221_v37 = vmax.f32 %v179_v31, 0.0  ;;  %v2987_v28 = vld [vmem:[%s4047_s5 + $0x1a8] ss:$16 sps:$4 sm:$0xff]   ;;  %v2992_v29 = vld [vmem:[%s4047_s5 + $0x1c4] ss:$16 sps:$4 sm:$0xff]  }
  0xeb   :  { %v219_v38 = vmax.f32 %v171_v35, 0.0  ;;  %v2993_v31 = vld [vmem:[%s4047_s5 + $0x1c8] ss:$16 sps:$4 sm:$0xff]   ;;  %941 = vmatprep.subr.bf16.mxu0 %v2992_v29  ;;  %v2998_v32 = vld [vmem:[%s4047_s5 + $0x1e4] ss:$16 sps:$4 sm:$0xff]  }
  0xec   :  { %v233_v39 = vpack.c.bf16 %v221_v37, %v220_v30  ;;  %1029 = vmatpush1.bf16.msra.mxu1 %v2915_v33  ;;  %v2995_v30 = vld [vmem:[%s4047_s5 + $0x1cc] ss:$16 sps:$4 sm:$0xff]   ;;  %v2999_v35 = vld [vmem:[%s4047_s5 + $0x1e8] ss:$16 sps:$4 sm:$0xff]   ;;  %v256_v37 = vlaneseq }
  0xed   :  { %v232_v41 = vpack.c.bf16 %v219_v38, %v218_v34  ;;  %v2777_v43 = vpop.f32.mrb[8].mxu0  ;;  %1030 = vmatprep.subr.bf16.mxu1 %v2923_v36  ;;  %v3001_v33 = vld [vmem:[%s4047_s5 + $0x1ec] ss:$16 sps:$4 sm:$0xff]   ;;  %v2996_v34 = vld [vmem:[%s4047_s5 + $0x1e0] ss:$16 sps:$4 sm:$0xff]  }
  0xee   :  { %v192_v45 = vadd.f32 %v2777_v43, %v3394_v8  ;;  %v183_v46 = vpop.f32.mrb[9].mxu0  ;;  %v3004_v36 = vld [vmem:[%s4049_s7 + $0x4] ss:$8 sps:$4 sm:$0xff]   ;;  %v3527_v38 = vshrl.u32 %v256_v37, 7 }
  0xef   :  { %389 = vmatmul.mubr.bf16.gmra.mrb[4].mxu1 %v231_v21  ;;  %v184_v47 = vadd.f32 %v3394_v8, %v183_v46  ;;  %v2778_v48 = vpop.f32.mrb[10].mxu0  ;;  %v2971_v21 = vld [vmem:[%s4047_s5 + $0x14c] ss:$16 sps:$4 sm:$0xff]  }
  0xf0   :  { %398 = vmatprep.mubr.bf16.mxu1 %v3122_v42  ;;  %v224_v49 = vmax.f32 %v192_v45, 0.0  ;;  %v195_v50 = vadd.f32 %v2778_v48, %v3394_v8  ;;  %v186_v51 = vpop.f32.mrb[11].mxu0  ;;  %1031 = vmatpush1.bf16.msra.mxu1 %v2921_v40  ;;  %v254_v40 = vld [vmem:[%s4050_s4] sm:$0x3] }
  0xf1   :  { %v222_v53 = vmax.f32 %v184_v47, 0.0  ;;  %v187_v54 = vadd.f32 %v3394_v8, %v186_v51  ;;  %1032 = vmatprep.subr.bf16.mxu1 %v2929_v44 }
  0xf2   :  { %v225_v56 = vmax.f32 %v195_v50, 0.0 }
  0xf3   :  { %v223_v57 = vmax.f32 %v187_v54, 0.0 }
  0xf4   :  { %v235_v58 = vpack.c.bf16 %v225_v56, %v224_v49  ;;  %1033 = vmatpush1.bf16.msra.mxu1 %v2927_v52 }
  0xf5   :  { %v234_v60 = vpack.c.bf16 %v223_v57, %v222_v53  ;;  %v2781_v61 = vpop.f32.mrb[12].mxu0  ;;  %1034 = vmatprep.subr.bf16.mxu1 %v2935_v55 }
  0xf6   :  { %v208_v63 = vadd.f32 %v2781_v61, %v3394_v8  ;;  %v199_v0 = vpop.f32.mrb[13].mxu0 }
  0xf7   :  { %399 = vmatmul.mubr.bf16.gmra.mrb[8].mxu1 %v232_v41  ;;  %v200_v1 = vadd.f32 %v3394_v8, %v199_v0  ;;  %v2782_v2 = vpop.f32.mrb[14].mxu0  ;;  %v3536_v41 = vsub.s32 1, %v3527_v38 }
  0xf8   :  { %408 = vmatprep.mubr.bf16.mxu1 %v3122_v42  ;;  %v228_v3 = vmax.f32 %v208_v63, 0.0  ;;  %v211_v4 = vadd.f32 %v2782_v2, %v3394_v8  ;;  %v202_v5 = vpop.f32.mrb[15].mxu0  ;;  %1035 = vmatpush1.bf16.msra.mxu1 %v2933_v59  ;;  %v3007_v63 = vld [vmem:[%s4049_s7 + $0x14] ss:$8 sps:$4 sm:$0xff]  }
  0xf9   :  { %v226_v7 = vmax.f32 %v200_v1, 0.0  ;;  %v203_v9 = vadd.f32 %v3394_v8, %v202_v5  ;;  %1036 = vmatprep.subr.bf16.mxu1 %v2941_v62  ;;  %v2951_v8 = vld [vmem:[%s4047_s5 + $0xe8] ss:$16 sps:$4 sm:$0xff]   ;;  %v3542_v44 = vrot.slane %v254_v40, %v3536_v41 }
  0xfa   :  { %v229_v11 = vmax.f32 %v211_v4, 0.0  ;;  %v3005_v5 = vld [vmem:[%s4049_s7 + $0x10] ss:$8 sps:$4 sm:$0xff]  }
  0xfb   :  { %v227_v12 = vmax.f32 %v203_v9, 0.0  ;;  %v3010_v9 = vld [vmem:[%s4049_s7 + $0x24] ss:$8 sps:$4 sm:$0xff]  }
  0xfc   :  { %v237_v13 = vpack.c.bf16 %v229_v11, %v228_v3  ;;  %1037 = vmatpush1.bf16.msra.mxu1 %v2939_v6 }
  0xfd   :  { %v236_v15 = vpack.c.bf16 %v227_v12, %v226_v7  ;;  %1038 = vmatprep.subr.bf16.mxu1 %v2947_v10 }
  0xff   :  { %409 = vmatmul.mubr.bf16.gmra.mrb[12].mxu1 %v233_v39  ;;  %v3530_v39 = vsub.s32 0, %v3527_v38 }
 0x100   :  { %418 = vmatprep.mubr.bf16.mxu1 %v3122_v42  ;;  %1039 = vmatpush1.bf16.msra.mxu1 %v2945_v14 }
 0x101   :  { %1040 = vmatprep.subr.bf16.mxu1 %v2953_v16  ;;  %v3539_v43 = vrot.slane %v254_v40, %v3530_v39 }
 0x104   :  { %1041 = vmatpush1.bf16.msra.mxu1 %v2951_v8 }
 0x105   :  { %1042 = vmatprep.subr.bf16.mxu1 %v2959_v17  ;;  %v3013_v17 = vld [vmem:[%s4049_s7 + $0x34] ss:$8 sps:$4 sm:$0xff]  }
 0x107   :  { %419 = vmatmul.mubr.bf16.gmra.mrb[16].mxu1 %v234_v60  ;;  %v3002_v60 = vld [vmem:[%s4049_s7] ss:$8 sps:$4 sm:$0xff]  }
 0x108   :  { %428 = vmatprep.mubr.bf16.mxu1 %v3122_v42  ;;  %1043 = vmatpush1.bf16.msra.mxu1 %v2957_v18 }
 0x109   :  { %1044 = vmatprep.subr.bf16.mxu1 %v2965_v19 }
 0x10c   :  { %1045 = vmatpush1.bf16.msra.mxu1 %v2963_v20 }
 0x10d   :  { %1046 = vmatprep.subr.bf16.mxu1 %v2971_v21 }
 0x10f   :  { %429 = vmatmul.mubr.bf16.gmra.mrb[20].mxu1 %v235_v58 }
 0x110   :  { %438 = vmatprep.mubr.bf16.mxu1 %v3122_v42  ;;  %1047 = vmatpush1.bf16.msra.mxu1 %v2969_v22 }
 0x111   :  { %1048 = vmatprep.subr.bf16.mxu1 %v2977_v23  ;;  %v3011_v23 = vld [vmem:[%s4049_s7 + $0x30] ss:$8 sps:$4 sm:$0xff]  }
 0x114   :  { %1049 = vmatpush1.bf16.msra.mxu1 %v2975_v24 }
 0x115   :  { %1050 = vmatprep.subr.bf16.mxu1 %v2983_v25 }
 0x117   :  { %439 = vmatmul.mubr.bf16.gmra.mrb[24].mxu1 %v236_v15  ;;  %v3008_v15 = vld [vmem:[%s4049_s7 + $0x20] ss:$8 sps:$4 sm:$0xff]  }
 0x118   :  { %448 = vmatprep.mubr.bf16.mxu1 %v3122_v42  ;;  %1051 = vmatpush1.bf16.msra.mxu1 %v2981_v26  ;;  %v2990_v42 = vld [vmem:[%s4047_s5 + $0x1c0] ss:$16 sps:$4 sm:$0xff]   ;;  %v3016_v26 = vld [vmem:[%s4049_s7 + $0x44] ss:$8 sps:$4 sm:$0xff]  }
 0x119   :  { %1052 = vmatprep.subr.bf16.mxu1 %v2989_v27  ;;  %942 = vmatpush1.bf16.msra.mxu0 %v2990_v42 }
 0x11a   :  { %943 = vmatprep.subr.bf16.mxu0 %v2998_v32 }
 0x11c   :  { %1053 = vmatpush1.bf16.msra.mxu1 %v2987_v28 }
 0x11d   :  { %1054 = vmatprep.subr.bf16.mxu1 %v2995_v30  ;;  %944 = vmatpush1.bf16.msra.mxu0 %v2996_v34  ;;  %v3019_v34 = vld [vmem:[%s4049_s7 + $0x54] ss:$8 sps:$4 sm:$0xff]  }
 0x11e   :  { %1631 = vmatprep.subr.bf16.mxu0 %v3004_v36 }
 0x11f   :  { %449 = vmatmul.mubr.bf16.gmra.mrb[28].mxu1 %v237_v13 }
 0x120   :  { %1055 = vmatpush1.bf16.msra.mxu1 %v2993_v31  ;;  %v3014_v31 = vld [vmem:[%s4049_s7 + $0x40] ss:$8 sps:$4 sm:$0xff]  }
 0x121   :  { %1056 = vmatprep.subr.bf16.mxu1 %v3001_v33 }
 0x124   :  { %1057 = vmatpush1.bf16.msra.mxu1 %v2999_v35 }
 0x1ba   :  { %v380_v45 = vpop.f32.mrb[0].mxu1 }
 0x1bb   :  { %v381_v46 = vadd.f32 %v380_v45, %v3539_v43  ;;  %v382_v47 = vpop.f32.mrb[1].mxu1 }
 0x1bc   :  { %v383_v48 = vadd.f32 %v382_v47, %v3542_v44  ;;  %v384_v49 = vpop.f32.mrb[2].mxu1 }
 0x1bd   :  { %v385_v50 = vadd.f32 %v384_v49, %v3539_v43  ;;  %v386_v51 = vpop.f32.mrb[3].mxu1  ;;  %v459_v53 = vmax.f32 %v381_v46, 0.0  ;;  %v3017_v46 = vld [vmem:[%s4049_s7 + $0x50] ss:$8 sps:$4 sm:$0xff]   ;;  %v3022_v49 = vld [vmem:[%s4049_s7 + $0x64] ss:$8 sps:$4 sm:$0xff]  }
 0x1be   :  { %v387_v52 = vadd.f32 %v386_v51, %v3542_v44  ;;  %v460_v55 = vmax.f32 %v383_v48, 0.0 }
 0x1bf   :  { %v461_v54 = vmax.f32 %v385_v50, 0.0 }
 0x1c0   :  { %v462_v56 = vmax.f32 %v387_v52, 0.0 }
 0x1c1   :  { %v491_v57 = vpack.c.bf16 %v461_v54, %v459_v53 }
 0x1c2   :  { %v492_v58 = vpack.c.bf16 %v462_v56, %v460_v55  ;;  %v390_v59 = vpop.f32.mrb[4].mxu1  ;;  %v3020_v55 = vld [vmem:[%s4049_s7 + $0x60] ss:$8 sps:$4 sm:$0xff]  }
 0x1c3   :  { %v391_v61 = vadd.f32 %v390_v59, %v3539_v43  ;;  %v392_v62 = vpop.f32.mrb[5].mxu1 }
 0x1c4   :  { %v393_v0 = vadd.f32 %v392_v62, %v3542_v44  ;;  %v394_v1 = vpop.f32.mrb[6].mxu1  ;;  %945 = vmatprep.mubr.bf16.mxu0 %v492_v58  ;;  %1058 = vmatprep.mubr.bf16.mxu1 %v492_v58  ;;  %v3025_v58 = vld [vmem:[%s4049_s7 + $0x74] ss:$8 sps:$4 sm:$0xff]  }
 0x1c5   :  { %v395_v2 = vadd.f32 %v394_v1, %v3539_v43  ;;  %v396_v3 = vpop.f32.mrb[7].mxu1  ;;  %946 = vmatmul.mubr.bf16.vlgmr.msra.gmra.mrb[16].mxu0 %v491_v57  ;;  %1059 = vmatmul.mubr.bf16.vlgmr.msra.gmra.mrb[32].mxu1 %v491_v57  ;;  %v463_v6 = vmax.f32 %v391_v61, 0.0 }
 0x1c6   :  { %v397_v4 = vadd.f32 %v396_v3, %v3542_v44  ;;  %1632 = vmatpush1.bf16.msra.mxu0 %v3002_v60  ;;  %v464_v10 = vmax.f32 %v393_v0, 0.0  ;;  %v3023_v0 = vld [vmem:[%s4049_s7 + $0x70] ss:$8 sps:$4 sm:$0xff]   ;;  %v3028_v3 = vld [vmem:[%s4049_s7 + $0x84] ss:$8 sps:$4 sm:$0xff]  }
 0x1c7   :  { %v465_v7 = vmax.f32 %v395_v2, 0.0  ;;  %1633 = vmatprep.subr.bf16.mxu0 %v3007_v63 }
 0x1c8   :  { %v466_v11 = vmax.f32 %v397_v4, 0.0 }
 0x1c9   :  { %v493_v12 = vpack.c.bf16 %v465_v7, %v463_v6 }
 0x1ca   :  { %v494_v13 = vpack.c.bf16 %v466_v11, %v464_v10  ;;  %v400_v14 = vpop.f32.mrb[8].mxu1  ;;  %1634 = vmatpush1.bf16.msra.mxu0 %v3005_v5  ;;  %v3026_v10 = vld [vmem:[%s4049_s7 + $0x80] ss:$8 sps:$4 sm:$0xff]  }
 0x1cb   :  { %v401_v16 = vadd.f32 %v400_v14, %v3539_v43  ;;  %v402_v8 = vpop.f32.mrb[9].mxu1  ;;  %1635 = vmatprep.subr.bf16.mxu0 %v3010_v9 }
 0x1cc   :  { %v403_v18 = vadd.f32 %v402_v8, %v3542_v44  ;;  %v404_v19 = vpop.f32.mrb[10].mxu1  ;;  %955 = vmatprep.mubr.bf16.mxu0 %v494_v13  ;;  %1068 = vmatprep.mubr.bf16.mxu1 %v494_v13  ;;  %v3031_v13 = vld [vmem:[%s4049_s7 + $0x94] ss:$8 sps:$4 sm:$0xff]  }
 0x1cd   :  { %v405_v20 = vadd.f32 %v404_v19, %v3539_v43  ;;  %v406_v21 = vpop.f32.mrb[11].mxu1  ;;  %956 = vmatmul.mubr.bf16.gmra.mrb[20].mxu0 %v493_v12  ;;  %1069 = vmatmul.mubr.bf16.gmra.mrb[36].mxu1 %v493_v12  ;;  %v467_v24 = vmax.f32 %v401_v16, 0.0 }
 0x1ce   :  { %v407_v22 = vadd.f32 %v406_v21, %v3542_v44  ;;  %1636 = vmatpush1.bf16.msra.mxu0 %v3008_v15  ;;  %v468_v27 = vmax.f32 %v403_v18, 0.0  ;;  %v3029_v18 = vld [vmem:[%s4049_s7 + $0x90] ss:$8 sps:$4 sm:$0xff]   ;;  %v3034_v21 = vld [vmem:[%s4049_s7 + $0xa4] ss:$8 sps:$4 sm:$0xff]  }
 0x1cf   :  { %v469_v25 = vmax.f32 %v405_v20, 0.0  ;;  %1637 = vmatprep.subr.bf16.mxu0 %v3013_v17 }
 0x1d0   :  { %v470_v28 = vmax.f32 %v407_v22, 0.0 }
 0x1d1   :  { %v495_v29 = vpack.c.bf16 %v469_v25, %v467_v24 }
 0x1d2   :  { %v496_v30 = vpack.c.bf16 %v470_v28, %v468_v27  ;;  %v410_v42 = vpop.f32.mrb[12].mxu1  ;;  %1638 = vmatpush1.bf16.msra.mxu0 %v3011_v23  ;;  %v3032_v27 = vld [vmem:[%s4049_s7 + $0xa0] ss:$8 sps:$4 sm:$0xff]  }
 0x1d3   :  { %v411_v32 = vadd.f32 %v410_v42, %v3539_v43  ;;  %v412_v33 = vpop.f32.mrb[13].mxu1  ;;  %1639 = vmatprep.subr.bf16.mxu0 %v3016_v26 }
 0x1d4   :  { %v413_v35 = vadd.f32 %v412_v33, %v3542_v44  ;;  %v414_v36 = vpop.f32.mrb[14].mxu1  ;;  %965 = vmatprep.mubr.bf16.mxu0 %v496_v30  ;;  %1078 = vmatprep.mubr.bf16.mxu1 %v496_v30  ;;  %v3037_v30 = vld [vmem:[%s4049_s7 + $0xb4] ss:$8 sps:$4 sm:$0xff]  }
 0x1d5   :  { %v415_v37 = vadd.f32 %v414_v36, %v3539_v43  ;;  %v416_v40 = vpop.f32.mrb[15].mxu1  ;;  %966 = vmatmul.mubr.bf16.gmra.mrb[24].mxu0 %v495_v29  ;;  %1079 = vmatmul.mubr.bf16.gmra.mrb[40].mxu1 %v495_v29  ;;  %v471_v47 = vmax.f32 %v411_v32, 0.0 }
 0x1d6   :  { %v417_v45 = vadd.f32 %v416_v40, %v3542_v44  ;;  %1640 = vmatpush1.bf16.msra.mxu0 %v3014_v31  ;;  %v472_v50 = vmax.f32 %v413_v35, 0.0  ;;  %v3035_v35 = vld [vmem:[%s4049_s7 + $0xb0] ss:$8 sps:$4 sm:$0xff]   ;;  %v3040_v40 = vld [vmem:[%s4049_s7 + $0xc4] ss:$8 sps:$4 sm:$0xff]  }
 0x1d7   :  { %v473_v48 = vmax.f32 %v415_v37, 0.0  ;;  %1641 = vmatprep.subr.bf16.mxu0 %v3019_v34 }
 0x1d8   :  { %v474_v51 = vmax.f32 %v417_v45, 0.0 }
 0x1d9   :  { %v497_v52 = vpack.c.bf16 %v473_v48, %v471_v47 }
 0x1da   :  { %v498_v53 = vpack.c.bf16 %v474_v51, %v472_v50  ;;  %v420_v54 = vpop.f32.mrb[16].mxu1  ;;  %1642 = vmatpush1.bf16.msra.mxu0 %v3017_v46  ;;  %v3038_v50 = vld [vmem:[%s4049_s7 + $0xc0] ss:$8 sps:$4 sm:$0xff]  }
 0x1db   :  { %v421_v56 = vadd.f32 %v420_v54, %v3539_v43  ;;  %v422_v57 = vpop.f32.mrb[17].mxu1  ;;  %1643 = vmatprep.subr.bf16.mxu0 %v3022_v49 }
 0x1dc   :  { %v423_v59 = vadd.f32 %v422_v57, %v3542_v44  ;;  %v424_v60 = vpop.f32.mrb[18].mxu1  ;;  %975 = vmatprep.mubr.bf16.mxu0 %v498_v53  ;;  %1088 = vmatprep.mubr.bf16.mxu1 %v498_v53  ;;  %v3043_v53 = vld [vmem:[%s4049_s7 + $0xd4] ss:$8 sps:$4 sm:$0xff]  }
 0x1dd   :  { %v425_v61 = vadd.f32 %v424_v60, %v3539_v43  ;;  %v426_v62 = vpop.f32.mrb[19].mxu1  ;;  %976 = vmatmul.mubr.bf16.gmra.mrb[28].mxu0 %v497_v52  ;;  %1089 = vmatmul.mubr.bf16.gmra.mrb[44].mxu1 %v497_v52  ;;  %v475_v1 = vmax.f32 %v421_v56, 0.0 }
 0x1de   :  { %v427_v63 = vadd.f32 %v426_v62, %v3542_v44  ;;  %1644 = vmatpush1.bf16.msra.mxu0 %v3020_v55  ;;  %v476_v4 = vmax.f32 %v423_v59, 0.0  ;;  %v3041_v59 = vld [vmem:[%s4049_s7 + $0xd0] ss:$8 sps:$4 sm:$0xff]  }
 0x1df   :  { %v477_v2 = vmax.f32 %v425_v61, 0.0  ;;  %1645 = vmatprep.subr.bf16.mxu0 %v3025_v58 }
 0x1e0   :  { %v478_v5 = vmax.f32 %v427_v63, 0.0 }
 0x1e1   :  { %v499_v6 = vpack.c.bf16 %v477_v2, %v475_v1  ;;  %v3049_v2 = vld [vmem:[%s4049_s7 + $0xf4] ss:$8 sps:$4 sm:$0xff]  }
 0x1e2   :  { %v500_v7 = vpack.c.bf16 %v478_v5, %v476_v4  ;;  %v430_v9 = vpop.f32.mrb[20].mxu1  ;;  %1646 = vmatpush1.bf16.msra.mxu0 %v3023_v0  ;;  %v3052_v4 = vld [vmem:[%s4049_s7 + $0x104] ss:$8 sps:$4 sm:$0xff]   ;;  %v583_v5 = vsub.s32 2, %v3527_v38 }
 0x1e3   :  { %v431_v11 = vadd.f32 %v430_v9, %v3539_v43  ;;  %v432_v12 = vpop.f32.mrb[21].mxu1  ;;  %1647 = vmatprep.subr.bf16.mxu0 %v3028_v3  ;;  %v3047_v3 = vld [vmem:[%s4049_s7 + $0xf0] ss:$8 sps:$4 sm:$0xff]  }
 0x1e4   :  { %v433_v14 = vadd.f32 %v432_v12, %v3542_v44  ;;  %v434_v15 = vpop.f32.mrb[22].mxu1  ;;  %985 = vmatprep.mubr.bf16.mxu0 %v500_v7  ;;  %1098 = vmatprep.mubr.bf16.mxu1 %v500_v7  ;;  %v587_v7 = vsub.s32 3, %v3527_v38 }
 0x1e5   :  { %v435_v16 = vadd.f32 %v434_v15, %v3539_v43  ;;  %v436_v8 = vpop.f32.mrb[23].mxu1  ;;  %986 = vmatmul.mubr.bf16.gmra.mrb[32].mxu0 %v499_v6  ;;  %1099 = vmatmul.mubr.bf16.gmra.mrb[48].mxu1 %v499_v6  ;;  %v479_v19 = vmax.f32 %v431_v11, 0.0  ;;  %v571_v6 = vld [vmem:[%s4051_s6] sm:$0xf] }
 0x1e6   :  { %v437_v17 = vadd.f32 %v436_v8, %v3542_v44  ;;  %1648 = vmatpush1.bf16.msra.mxu0 %v3026_v10  ;;  %v480_v22 = vmax.f32 %v433_v14, 0.0  ;;  %v3678_v9 = vrot.slane %v571_v6, %v3530_v39  ;;  %v3680_v10 = vrot.slane %v571_v6, %v583_v5 }
 0x1e7   :  { %v481_v20 = vmax.f32 %v435_v16, 0.0  ;;  %1649 = vmatprep.subr.bf16.mxu0 %v3031_v13  ;;  %v3683_v11 = vrot.slane %v571_v6, %v3536_v41  ;;  %v3685_v12 = vrot.slane %v571_v6, %v587_v7  ;;  %v3104_v6 = vld [vmem:[%s4052_s9 + $0x58] sm:$0xff]  }
 0x1e8   :  { %v482_v23 = vmax.f32 %v437_v17, 0.0 }
 0x1e9   :  { %v501_v24 = vpack.c.bf16 %v481_v20, %v479_v19 }
 0x1ea   :  { %v502_v25 = vpack.c.bf16 %v482_v23, %v480_v22  ;;  %v440_v26 = vpop.f32.mrb[24].mxu1  ;;  %1650 = vmatpush1.bf16.msra.mxu0 %v3029_v18 }
 0x1eb   :  { %v441_v28 = vadd.f32 %v440_v26, %v3539_v43  ;;  %v442_v29 = vpop.f32.mrb[25].mxu1  ;;  %1651 = vmatprep.subr.bf16.mxu0 %v3034_v21 }
 0x1ec   :  { %v443_v42 = vadd.f32 %v442_v29, %v3542_v44  ;;  %v444_v31 = vpop.f32.mrb[26].mxu1  ;;  %995 = vmatprep.mubr.bf16.mxu0 %v502_v25  ;;  %1108 = vmatprep.mubr.bf16.mxu1 %v502_v25 }
 0x1ed   :  { %v445_v32 = vadd.f32 %v444_v31, %v3539_v43  ;;  %v446_v33 = vpop.f32.mrb[27].mxu1  ;;  %996 = vmatmul.mubr.bf16.gmra.mrb[36].mxu0 %v501_v24  ;;  %1109 = vmatmul.mubr.bf16.gmra.mrb[52].mxu1 %v501_v24  ;;  %v483_v36 = vmax.f32 %v441_v28, 0.0 }
 0x1ee   :  { %v447_v34 = vadd.f32 %v446_v33, %v3542_v44  ;;  %1652 = vmatpush1.bf16.msra.mxu0 %v3032_v27  ;;  %v484_v45 = vmax.f32 %v443_v42, 0.0  ;;  %v3099_v33 = vld [vmem:[%s4052_s9] sm:$0xff]  }
 0x1ef   :  { %v485_v37 = vmax.f32 %v445_v32, 0.0  ;;  %1653 = vmatprep.subr.bf16.mxu0 %v3037_v30  ;;  %v3098_v32 = vld [vmem:[%s4052_s9 + $0x40] sm:$0xff]  }
 0x1f0   :  { %v486_v46 = vmax.f32 %v447_v34, 0.0  ;;  %2683 = vmatprep.subr.bf16.mxu1 %v3098_v32 }
 0x1f1   :  { %v503_v47 = vpack.c.bf16 %v485_v37, %v483_v36  ;;  %v3050_v36 = vld [vmem:[%s4049_s7 + $0x100] ss:$8 sps:$4 sm:$0xff]   ;;  %2684 = vmatpush3.bf16.msra.mxu1 %v3099_v33  ;;  %v3059_v33 = vld [vmem:[%s4049_s7 + $0x130] ss:$8 sps:$4 sm:$0xff]  }
 0x1f2   :  { %v504_v48 = vpack.c.bf16 %v486_v46, %v484_v45  ;;  %v450_v49 = vpop.f32.mrb[28].mxu1  ;;  %1654 = vmatpush1.bf16.msra.mxu0 %v3035_v35  ;;  %v3055_v45 = vld [vmem:[%s4049_s7 + $0x114] ss:$8 sps:$4 sm:$0xff]   ;;  %v3100_v46 = vld [vmem:[%s4052_s9 + $0x48] sm:$0xff]  }
 0x1f3   :  { %v451_v51 = vadd.f32 %v450_v49, %v3539_v43  ;;  %v452_v52 = vpop.f32.mrb[29].mxu1  ;;  %1655 = vmatprep.subr.bf16.mxu0 %v3040_v40  ;;  %2685 = vmatprep.subr.bf16.mxu1 %v3100_v46  ;;  %v3107_v46 = vld [vmem:[%s4052_s9 + $0x20] sm:$0xff]  }
 0x1f4   :  { %v453_v54 = vadd.f32 %v452_v52, %v3542_v44  ;;  %v454_v55 = vpop.f32.mrb[30].mxu1  ;;  %1005 = vmatprep.mubr.bf16.mxu0 %v504_v48  ;;  %1118 = vmatprep.mubr.bf16.mxu1 %v504_v48  ;;  %v3102_v52 = vld [vmem:[%s4052_s9 + $0x50] sm:$0xff]  }
 0x1f5   :  { %v455_v56 = vadd.f32 %v454_v55, %v3539_v43  ;;  %v456_v57 = vpop.f32.mrb[31].mxu1  ;;  %1006 = vmatmul.mubr.bf16.gmra.mrb[40].mxu0 %v503_v47  ;;  %1119 = vmatmul.mubr.bf16.gmra.mrb[56].mxu1 %v503_v47  ;;  %v487_v60 = vmax.f32 %v451_v51, 0.0  ;;  %v3046_v43 = vld [vmem:[%s4049_s7 + $0xe4] ss:$8 sps:$4 sm:$0xff]  }
 0x1f6   :  { %v457_v58 = vadd.f32 %v456_v57, %v3542_v44  ;;  %1656 = vmatpush1.bf16.msra.mxu0 %v3038_v50  ;;  %v488_v62 = vmax.f32 %v453_v54, 0.0  ;;  %v3044_v44 = vld [vmem:[%s4049_s7 + $0xe0] ss:$8 sps:$4 sm:$0xff]  }
 0x1f7   :  { %v489_v61 = vmax.f32 %v455_v56, 0.0  ;;  %1657 = vmatprep.subr.bf16.mxu0 %v3043_v53  ;;  %v3101_v51 = vld [vmem:[%s4052_s9 + $0x8] sm:$0xff]  }
 0x1f8   :  { %v490_v63 = vmax.f32 %v457_v58, 0.0  ;;  %2686 = vmatpush3.bf16.msra.mxu1 %v3101_v51 }
 0x1f9   :  { %v505_v0 = vpack.c.bf16 %v489_v61, %v487_v60  ;;  %v3053_v61 = vld [vmem:[%s4049_s7 + $0x110] ss:$8 sps:$4 sm:$0xff]   ;;  %2687 = vmatprep.subr.bf16.mxu1 %v3102_v52 }
 0x1fa   :  { %v506_v1 = vpack.c.bf16 %v490_v63, %v488_v62  ;;  %1658 = vmatpush1.bf16.msra.mxu0 %v3041_v59 }
 0x1fb   :  { %1659 = vmatprep.subr.bf16.mxu0 %v3046_v43 }
 0x1fc   :  { %1015 = vmatprep.mubr.bf16.mxu0 %v506_v1  ;;  %1128 = vmatprep.mubr.bf16.mxu1 %v506_v1 }
 0x1fd   :  { %1016 = vmatmul.mubr.bf16.gmra.mrb[44].mxu0 %v505_v0  ;;  %1129 = vmatmul.mubr.bf16.gmra.mrb[60].mxu1 %v505_v0 }
 0x1fe   :  { %1660 = vmatpush1.bf16.msra.mxu0 %v3044_v44  ;;  %v3058_v44 = vld [vmem:[%s4049_s7 + $0x124] ss:$8 sps:$4 sm:$0xff]  }
 0x1ff   :  { %1661 = vmatprep.subr.bf16.mxu0 %v3049_v2  ;;  %v3103_v2 = vld [vmem:[%s4052_s9 + $0x10] sm:$0xff]  }
 0x200   :  { %2688 = vmatpush3.bf16.msra.mxu1 %v3103_v2 }
 0x201   :  { %2689 = vmatprep.subr.bf16.mxu1 %v3104_v6  ;;  %v3110_v6 = vld [vmem:[%s4052_s9 + $0x70] sm:$0xff]  }
 0x202   :  { %1662 = vmatpush1.bf16.msra.mxu0 %v3047_v3 }
 0x203   :  { %1744 = vmatprep.subr.bf16.mxu0 %v3052_v4 }
 0x298   :  { %v947_v13 = vpop.f32.mrb[16].mxu0  ;;  %v1060_v14 = vpop.f32.mrb[32].mxu1 }
 0x299   :  { %v948_v15 = vadd.f32 %v947_v13, %v3678_v9  ;;  %v1061_v16 = vadd.f32 %v1060_v14, %v3680_v10  ;;  %v949_v8 = vpop.f32.mrb[17].mxu0  ;;  %v1062_v17 = vpop.f32.mrb[33].mxu1 }
 0x29a   :  { %v950_v38 = vadd.f32 %v949_v8, %v3683_v11  ;;  %v1063_v18 = vadd.f32 %v1062_v17, %v3685_v12  ;;  %v951_v19 = vpop.f32.mrb[18].mxu0  ;;  %v1064_v20 = vpop.f32.mrb[34].mxu1  ;;  %v3056_v17 = vld [vmem:[%s4049_s7 + $0x120] ss:$8 sps:$4 sm:$0xff]  }
 0x29b   :  { %v1139_v21 = vmax.f32 %v948_v15, 0.0  ;;  %v1141_v22 = vmax.f32 %v1061_v16, 0.0  ;;  %v952_v23 = vadd.f32 %v951_v19, %v3678_v9  ;;  %v1065_v24 = vadd.f32 %v1064_v20, %v3680_v10  ;;  %v953_v25 = vpop.f32.mrb[19].mxu0  ;;  %v1066_v26 = vpop.f32.mrb[35].mxu1  ;;  %v3061_v19 = vld [vmem:[%s4049_s7 + $0x134] ss:$8 sps:$4 sm:$0xff]  }
 0x29c   :  { %v1140_v27 = vmax.f32 %v950_v38, 0.0  ;;  %v1142_v28 = vmax.f32 %v1063_v18, 0.0  ;;  %v954_v29 = vadd.f32 %v953_v25, %v3683_v11  ;;  %v1067_v30 = vadd.f32 %v1066_v26, %v3685_v12  ;;  %v3106_v25 = vld [vmem:[%s4052_s9 + $0x60] sm:$0xff]  }
 0x29d   :  { %v1143_v42 = vmax.f32 %v952_v23, 0.0  ;;  %v1145_v31 = vmax.f32 %v1065_v24, 0.0  ;;  %v3105_v24 = vld [vmem:[%s4052_s9 + $0x18] sm:$0xff]  }
 0x29e   :  { %v1144_v34 = vmax.f32 %v954_v29, 0.0  ;;  %v1146_v35 = vmax.f32 %v1067_v30, 0.0  ;;  %2690 = vmatpush3.bf16.msra.mxu1 %v3105_v24 }
 0x29f   :  { %v1203_v37 = vpack.c.bf16 %v1143_v42, %v1139_v21  ;;  %v3704_v40 = vpack.c.bf16 %v1145_v31, %v1141_v22  ;;  %2691 = vmatprep.subr.bf16.mxu1 %v3106_v25 }
 0x2a0   :  { %v1204_v47 = vpack.c.bf16 %v1144_v34, %v1140_v27  ;;  %v3712_v48 = vpack.c.bf16 %v1146_v35, %v1142_v28  ;;  %v957_v49 = vpop.f32.mrb[20].mxu0  ;;  %v1070_v50 = vpop.f32.mrb[36].mxu1 }
 0x2a1   :  { %v958_v53 = vadd.f32 %v957_v49, %v3678_v9  ;;  %v1071_v54 = vadd.f32 %v1070_v50, %v3680_v10  ;;  %v959_v55 = vpop.f32.mrb[21].mxu0  ;;  %v1072_v56 = vpop.f32.mrb[37].mxu1  ;;  %v3108_v50 = vld [vmem:[%s4052_s9 + $0x68] sm:$0xff]  }
 0x2a2   :  { %v960_v57 = vadd.f32 %v959_v55, %v3683_v11  ;;  %v1073_v58 = vadd.f32 %v1072_v56, %v3685_v12  ;;  %v961_v59 = vpop.f32.mrb[22].mxu0  ;;  %v1074_v60 = vpop.f32.mrb[38].mxu1  ;;  %1663 = vmatprep.mubr.bf16.mxu0 %v1204_v47  ;;  %2692 = vmatpush3.bf16.msra.mxu1 %v3107_v46 }
 0x2a3   :  { %v1147_v62 = vmax.f32 %v958_v53, 0.0  ;;  %v962_v63 = vadd.f32 %v961_v59, %v3678_v9  ;;  %v1075_v0 = vadd.f32 %v1074_v60, %v3680_v10  ;;  %v963_v1 = vpop.f32.mrb[23].mxu0  ;;  %v1076_v43 = vpop.f32.mrb[39].mxu1  ;;  %1664 = vmatmul.mubr.bf16.vlgmr.msra.gmra.mrb[48].mxu0 %v1203_v37  ;;  %v1149_v3 = vmax.f32 %v1071_v54, 0.0  ;;  %2693 = vmatprep.subr.bf16.mxu1 %v3108_v50 }
 0x2a4   :  { %v964_v4 = vadd.f32 %v963_v1, %v3683_v11  ;;  %v1077_v5 = vadd.f32 %v1076_v43, %v3685_v12  ;;  %1745 = vmatpush1.bf16.msra.mxu0 %v3050_v36  ;;  %v1148_v14 = vmax.f32 %v960_v57, 0.0  ;;  %v1150_v15 = vmax.f32 %v1073_v58, 0.0  ;;  %v3062_v1 = vld [vmem:[%s4049_s7 + $0x140] ss:$8 sps:$4 sm:$0xff]  }
 0x2a5   :  { %v1151_v7 = vmax.f32 %v962_v63, 0.0  ;;  %v1153_v13 = vmax.f32 %v1075_v0, 0.0  ;;  %1746 = vmatprep.subr.bf16.mxu0 %v3055_v45  ;;  %v3064_v45 = vld [vmem:[%s4049_s7 + $0x144] ss:$8 sps:$4 sm:$0xff]  }
 0x2a6   :  { %v1152_v16 = vmax.f32 %v964_v4, 0.0  ;;  %v1154_v8 = vmax.f32 %v1077_v5, 0.0  ;;  %v3109_v43 = vld [vmem:[%s4052_s9 + $0x28] sm:$0xff]   ;;  %v3067_v5 = vld [vmem:[%s4049_s7 + $0x154] ss:$8 sps:$4 sm:$0xff]  }
 0x2a7   :  { %v1207_v38 = vpack.c.bf16 %v1151_v7, %v1147_v62  ;;  %v3743_v18 = vpack.c.bf16 %v1153_v13, %v1149_v3  ;;  %2694 = vmatpush3.bf16.msra.mxu1 %v3109_v43 }
 0x2a8   :  { %v1208_v20 = vpack.c.bf16 %v1152_v16, %v1148_v14  ;;  %v3748_v21 = vpack.c.bf16 %v1154_v8, %v1150_v15  ;;  %1747 = vmatpush1.bf16.msra.mxu0 %v3053_v61  ;;  %v967_v22 = vpop.f32.mrb[24].mxu0  ;;  %v1080_v23 = vpop.f32.mrb[40].mxu1  ;;  %2695 = vmatprep.subr.bf16.mxu1 %v3110_v6 }
 0x2a9   :  { %v968_v26 = vadd.f32 %v967_v22, %v3678_v9  ;;  %v1081_v27 = vadd.f32 %v1080_v23, %v3680_v10  ;;  %v969_v28 = vpop.f32.mrb[25].mxu0  ;;  %v1082_v29 = vpop.f32.mrb[41].mxu1  ;;  %1748 = vmatprep.subr.bf16.mxu0 %v3058_v44  ;;  %v3065_v22 = vld [vmem:[%s4049_s7 + $0x150] ss:$8 sps:$4 sm:$0xff]  }
 0x2aa   :  { %v970_v30 = vadd.f32 %v969_v28, %v3683_v11  ;;  %v1083_v42 = vadd.f32 %v1082_v29, %v3685_v12  ;;  %v971_v31 = vpop.f32.mrb[26].mxu0  ;;  %v1084_v32 = vpop.f32.mrb[42].mxu1  ;;  %1673 = vmatprep.mubr.bf16.mxu0 %v1208_v20  ;;  %v3111_v23 = vld [vmem:[%s4052_s9 + $0x30] sm:$0xff]   ;;  %v3070_v28 = vld [vmem:[%s4049_s7 + $0x164] ss:$8 sps:$4 sm:$0xff]  }
 0x2ab   :  { %v972_v34 = vadd.f32 %v971_v31, %v3678_v9  ;;  %v1085_v35 = vadd.f32 %v1084_v32, %v3680_v10  ;;  %v973_v36 = vpop.f32.mrb[27].mxu0  ;;  %v1086_v37 = vpop.f32.mrb[43].mxu1  ;;  %1674 = vmatmul.mubr.bf16.gmra.mrb[52].mxu0 %v1207_v38  ;;  %v1155_v51 = vmax.f32 %v968_v26, 0.0  ;;  %v1157_v52 = vmax.f32 %v1081_v27, 0.0  ;;  %2696 = vmatpush3.bf16.msra.mxu1 %v3111_v23 }
 0x2ac   :  { %v974_v47 = vadd.f32 %v973_v36, %v3683_v11  ;;  %v1087_v49 = vadd.f32 %v1086_v37, %v3685_v12  ;;  %1749 = vmatpush1.bf16.msra.mxu0 %v3056_v17  ;;  %v1156_v55 = vmax.f32 %v970_v30, 0.0  ;;  %v1158_v56 = vmax.f32 %v1083_v42, 0.0 }
 0x2ad   :  { %v1159_v53 = vmax.f32 %v972_v34, 0.0  ;;  %v1161_v54 = vmax.f32 %v1085_v35, 0.0  ;;  %1750 = vmatprep.subr.bf16.mxu0 %v3061_v19 }
 0x2ae   :  { %v1160_v57 = vmax.f32 %v974_v47, 0.0  ;;  %v1162_v58 = vmax.f32 %v1087_v49, 0.0 }
 0x2af   :  { %v1211_v59 = vpack.c.bf16 %v1159_v53, %v1155_v51  ;;  %v3776_v60 = vpack.c.bf16 %v1161_v54, %v1157_v52  ;;  %v3073_v51 = vld [vmem:[%s4049_s7 + $0x174] ss:$8 sps:$4 sm:$0xff]  }
 0x2b0   :  { %v1212_v61 = vpack.c.bf16 %v1160_v57, %v1156_v55  ;;  %v3778_v62 = vpack.c.bf16 %v1162_v58, %v1158_v56  ;;  %1751 = vmatpush1.bf16.msra.mxu0 %v3059_v33  ;;  %v977_v63 = vpop.f32.mrb[28].mxu0  ;;  %v1090_v0 = vpop.f32.mrb[44].mxu1 }
 0x2b1   :  { %v978_v44 = vadd.f32 %v977_v63, %v3678_v9  ;;  %v1091_v2 = vadd.f32 %v1090_v0, %v3680_v10  ;;  %v979_v3 = vpop.f32.mrb[29].mxu0  ;;  %v1092_v4 = vpop.f32.mrb[45].mxu1  ;;  %1752 = vmatprep.subr.bf16.mxu0 %v3064_v45  ;;  %v3068_v45 = vld [vmem:[%s4049_s7 + $0x160] ss:$8 sps:$4 sm:$0xff]   ;;  %v3071_v0 = vld [vmem:[%s4049_s7 + $0x170] ss:$8 sps:$4 sm:$0xff]  }
 0x2b2   :  { %v980_v7 = vadd.f32 %v979_v3, %v3683_v11  ;;  %v1093_v13 = vadd.f32 %v1092_v4, %v3685_v12  ;;  %v981_v14 = vpop.f32.mrb[30].mxu0  ;;  %v1094_v15 = vpop.f32.mrb[46].mxu1  ;;  %1683 = vmatprep.mubr.bf16.mxu0 %v1212_v61  ;;  %v3076_v3 = vld [vmem:[%s4049_s7 + $0x184] ss:$8 sps:$4 sm:$0xff]  }
 0x2b3   :  { %v982_v16 = vadd.f32 %v981_v14, %v3678_v9  ;;  %v1095_v8 = vadd.f32 %v1094_v15, %v3680_v10  ;;  %v983_v17 = vpop.f32.mrb[31].mxu0  ;;  %v1096_v38 = vpop.f32.mrb[47].mxu1  ;;  %1684 = vmatmul.mubr.bf16.gmra.mrb[56].mxu0 %v1211_v59  ;;  %v1163_v24 = vmax.f32 %v978_v44, 0.0  ;;  %v1165_v25 = vmax.f32 %v1091_v2, 0.0 }
 0x2b4   :  { %v984_v19 = vadd.f32 %v983_v17, %v3683_v11  ;;  %v1097_v20 = vadd.f32 %v1096_v38, %v3685_v12  ;;  %1753 = vmatpush1.bf16.msra.mxu0 %v3062_v1  ;;  %v1164_v29 = vmax.f32 %v980_v7, 0.0  ;;  %v1166_v30 = vmax.f32 %v1093_v13, 0.0  ;;  %v3074_v38 = vld [vmem:[%s4049_s7 + $0x180] ss:$8 sps:$4 sm:$0xff]  }
 0x2b5   :  { %v1167_v26 = vmax.f32 %v982_v16, 0.0  ;;  %v1169_v27 = vmax.f32 %v1095_v8, 0.0  ;;  %1754 = vmatprep.subr.bf16.mxu0 %v3067_v5 }
 0x2b6   :  { %v1168_v42 = vmax.f32 %v984_v19, 0.0  ;;  %v1170_v31 = vmax.f32 %v1097_v20, 0.0 }
 0x2b7   :  { %v1215_v32 = vpack.c.bf16 %v1167_v26, %v1163_v24  ;;  %v3809_v33 = vpack.c.bf16 %v1169_v27, %v1165_v25  ;;  %v3079_v24 = vld [vmem:[%s4049_s7 + $0x194] ss:$8 sps:$4 sm:$0xff]  }
 0x2b8   :  { %v1216_v34 = vpack.c.bf16 %v1168_v42, %v1164_v29  ;;  %v3811_v35 = vpack.c.bf16 %v1170_v31, %v1166_v30  ;;  %1755 = vmatpush1.bf16.msra.mxu0 %v3065_v22  ;;  %v987_v36 = vpop.f32.mrb[32].mxu0  ;;  %v1100_v37 = vpop.f32.mrb[48].mxu1 }
 0x2b9   :  { %v988_v46 = vadd.f32 %v987_v36, %v3678_v9  ;;  %v1101_v47 = vadd.f32 %v1100_v37, %v3680_v10  ;;  %v989_v49 = vpop.f32.mrb[33].mxu0  ;;  %v1102_v50 = vpop.f32.mrb[49].mxu1  ;;  %1756 = vmatprep.subr.bf16.mxu0 %v3070_v28  ;;  %v3077_v36 = vld [vmem:[%s4049_s7 + $0x190] ss:$8 sps:$4 sm:$0xff]  }
 0x2ba   :  { %v990_v52 = vadd.f32 %v989_v49, %v3683_v11  ;;  %v1103_v53 = vadd.f32 %v1102_v50, %v3685_v12  ;;  %v991_v54 = vpop.f32.mrb[34].mxu0  ;;  %v1104_v55 = vpop.f32.mrb[50].mxu1  ;;  %1693 = vmatprep.mubr.bf16.mxu0 %v1216_v34  ;;  %v3082_v49 = vld [vmem:[%s4049_s7 + $0x1a4] ss:$8 sps:$4 sm:$0xff]  }
 0x2bb   :  { %v992_v56 = vadd.f32 %v991_v54, %v3678_v9  ;;  %v1105_v57 = vadd.f32 %v1104_v55, %v3680_v10  ;;  %v993_v58 = vpop.f32.mrb[35].mxu0  ;;  %v1106_v59 = vpop.f32.mrb[51].mxu1  ;;  %1694 = vmatmul.mubr.bf16.gmra.mrb[60].mxu0 %v1215_v32  ;;  %v1171_v1 = vmax.f32 %v988_v46, 0.0  ;;  %v1173_v43 = vmax.f32 %v1101_v47, 0.0 }
 0x2bc   :  { %v994_v61 = vadd.f32 %v993_v58, %v3683_v11  ;;  %v1107_v63 = vadd.f32 %v1106_v59, %v3685_v12  ;;  %1757 = vmatpush1.bf16.msra.mxu0 %v3068_v45  ;;  %v1172_v4 = vmax.f32 %v990_v52, 0.0  ;;  %v1174_v5 = vmax.f32 %v1103_v53, 0.0 }
 0x2bd   :  { %v1175_v44 = vmax.f32 %v992_v56, 0.0  ;;  %v1177_v2 = vmax.f32 %v1105_v57, 0.0  ;;  %1758 = vmatprep.subr.bf16.mxu0 %v3073_v51 }
 0x2be   :  { %v1176_v6 = vmax.f32 %v994_v61, 0.0  ;;  %v1178_v7 = vmax.f32 %v1107_v63, 0.0  ;;  %v3080_v61 = vld [vmem:[%s4049_s7 + $0x1a0] ss:$8 sps:$4 sm:$0xff]  }
 0x2bf   :  { %v1219_v13 = vpack.c.bf16 %v1175_v44, %v1171_v1  ;;  %v3833_v14 = vpack.c.bf16 %v1177_v2, %v1173_v43  ;;  %v3085_v44 = vld [vmem:[%s4049_s7 + $0x1b4] ss:$8 sps:$4 sm:$0xff]  }
 0x2c0   :  { %v1220_v15 = vpack.c.bf16 %v1176_v6, %v1172_v4  ;;  %v3835_v16 = vpack.c.bf16 %v1178_v7, %v1174_v5  ;;  %1759 = vmatpush1.bf16.msra.mxu0 %v3071_v0  ;;  %v997_v8 = vpop.f32.mrb[36].mxu0  ;;  %v1110_v17 = vpop.f32.mrb[52].mxu1 }
 0x2c1   :  { %v998_v19 = vadd.f32 %v997_v8, %v3678_v9  ;;  %v1111_v20 = vadd.f32 %v1110_v17, %v3680_v10  ;;  %v999_v22 = vpop.f32.mrb[37].mxu0  ;;  %v1112_v23 = vpop.f32.mrb[53].mxu1  ;;  %1760 = vmatprep.subr.bf16.mxu0 %v3076_v3 }
 0x2c2   :  { %v1000_v25 = vadd.f32 %v999_v22, %v3683_v11  ;;  %v1113_v26 = vadd.f32 %v1112_v23, %v3685_v12  ;;  %v1001_v27 = vpop.f32.mrb[38].mxu0  ;;  %v1114_v28 = vpop.f32.mrb[54].mxu1  ;;  %1703 = vmatprep.mubr.bf16.mxu0 %v1220_v15 }
 0x2c3   :  { %v1002_v29 = vadd.f32 %v1001_v27, %v3678_v9  ;;  %v1115_v30 = vadd.f32 %v1114_v28, %v3680_v10  ;;  %v1003_v42 = vpop.f32.mrb[39].mxu0  ;;  %v1116_v31 = vpop.f32.mrb[55].mxu1  ;;  %1704 = vmatmul.mubr.bf16.gmra.mrb[64].mxu0 %v1219_v13  ;;  %v1179_v37 = vmax.f32 %v998_v19, 0.0  ;;  %v1181_v45 = vmax.f32 %v1111_v20, 0.0 }
 0x2c4   :  { %v1004_v32 = vadd.f32 %v1003_v42, %v3683_v11  ;;  %v1117_v34 = vadd.f32 %v1116_v31, %v3685_v12  ;;  %1761 = vmatpush1.bf16.msra.mxu0 %v3074_v38  ;;  %v1180_v50 = vmax.f32 %v1000_v25, 0.0  ;;  %v1182_v51 = vmax.f32 %v1113_v26, 0.0  ;;  %v3083_v38 = vld [vmem:[%s4049_s7 + $0x1b0] ss:$8 sps:$4 sm:$0xff]  }
 0x2c5   :  { %v1183_v46 = vmax.f32 %v1002_v29, 0.0  ;;  %v1185_v47 = vmax.f32 %v1115_v30, 0.0  ;;  %1762 = vmatprep.subr.bf16.mxu0 %v3079_v24  ;;  %v3088_v24 = vld [vmem:[%s4049_s7 + $0x1c4] ss:$8 sps:$4 sm:$0xff]  }
 0x2c6   :  { %v1184_v52 = vmax.f32 %v1004_v32, 0.0  ;;  %v1186_v53 = vmax.f32 %v1117_v34, 0.0 }
 0x2c7   :  { %v1223_v54 = vpack.c.bf16 %v1183_v46, %v1179_v37  ;;  %v3857_v55 = vpack.c.bf16 %v1185_v47, %v1181_v45 }
 0x2c8   :  { %v1224_v56 = vpack.c.bf16 %v1184_v52, %v1180_v50  ;;  %v3859_v57 = vpack.c.bf16 %v1186_v53, %v1182_v51  ;;  %1763 = vmatpush1.bf16.msra.mxu0 %v3077_v36  ;;  %v1007_v58 = vpop.f32.mrb[40].mxu0  ;;  %v1120_v59 = vpop.f32.mrb[56].mxu1  ;;  %v3086_v36 = vld [vmem:[%s4049_s7 + $0x1c0] ss:$8 sps:$4 sm:$0xff]  }
 0x2c9   :  { %v1008_v63 = vadd.f32 %v1007_v58, %v3678_v9  ;;  %v1121_v0 = vadd.f32 %v1120_v59, %v3680_v10  ;;  %v1009_v1 = vpop.f32.mrb[41].mxu0  ;;  %v1122_v43 = vpop.f32.mrb[57].mxu1  ;;  %1764 = vmatprep.subr.bf16.mxu0 %v3082_v49  ;;  %v3091_v49 = vld [vmem:[%s4049_s7 + $0x1d4] ss:$8 sps:$4 sm:$0xff]  }
 0x2ca   :  { %v1010_v2 = vadd.f32 %v1009_v1, %v3683_v11  ;;  %v1123_v3 = vadd.f32 %v1122_v43, %v3685_v12  ;;  %v1011_v4 = vpop.f32.mrb[42].mxu0  ;;  %v1124_v5 = vpop.f32.mrb[58].mxu1  ;;  %1713 = vmatprep.mubr.bf16.mxu0 %v1224_v56 }
 0x2cb   :  { %v1012_v6 = vadd.f32 %v1011_v4, %v3678_v9  ;;  %v1125_v7 = vadd.f32 %v1124_v5, %v3680_v10  ;;  %v1013_v13 = vpop.f32.mrb[43].mxu0  ;;  %v1126_v15 = vpop.f32.mrb[59].mxu1  ;;  %1714 = vmatmul.mubr.bf16.gmra.mrb[68].mxu0 %v1223_v54  ;;  %v1187_v19 = vmax.f32 %v1008_v63, 0.0  ;;  %v1189_v20 = vmax.f32 %v1121_v0, 0.0  ;;  %v3089_v0 = vld [vmem:[%s4049_s7 + $0x1d0] ss:$8 sps:$4 sm:$0xff]  }
 0x2cc   :  { %v1014_v8 = vadd.f32 %v1013_v13, %v3683_v11  ;;  %v1127_v17 = vadd.f32 %v1126_v15, %v3685_v12  ;;  %1765 = vmatpush1.bf16.msra.mxu0 %v3080_v61  ;;  %v1188_v25 = vmax.f32 %v1010_v2, 0.0  ;;  %v1190_v26 = vmax.f32 %v1123_v3, 0.0  ;;  %v3092_v13 = vld [vmem:[%s4049_s7 + $0x1e0] ss:$8 sps:$4 sm:$0xff]   ;;  %v3097_v15 = vld [vmem:[%s4049_s7 + $0x1f4] ss:$8 sps:$4 sm:$0xff]  }
 0x2cd   :  { %v1191_v22 = vmax.f32 %v1012_v6, 0.0  ;;  %v1193_v23 = vmax.f32 %v1125_v7, 0.0  ;;  %1766 = vmatprep.subr.bf16.mxu0 %v3085_v44 }
 0x2ce   :  { %v1192_v27 = vmax.f32 %v1014_v8, 0.0  ;;  %v1194_v28 = vmax.f32 %v1127_v17, 0.0  ;;  %v3095_v8 = vld [vmem:[%s4049_s7 + $0x1f0] ss:$8 sps:$4 sm:$0xff]  }
 0x2cf   :  { %v1227_v29 = vpack.c.bf16 %v1191_v22, %v1187_v19  ;;  %v3881_v30 = vpack.c.bf16 %v1193_v23, %v1189_v20 }
 0x2d0   :  { %v1228_v42 = vpack.c.bf16 %v1192_v27, %v1188_v25  ;;  %v1230_v31 = vpack.c.bf16 %v1194_v28, %v1190_v26  ;;  %1767 = vmatpush1.bf16.msra.mxu0 %v3083_v38  ;;  %v1017_v32 = vpop.f32.mrb[44].mxu0  ;;  %v1130_v34 = vpop.f32.mrb[60].mxu1  ;;  %v3115_v27 = vld [vmem:[%s4053_s11 + $0x8] sm:$0xff]  }
 0x2d1   :  { %v1018_v37 = vadd.f32 %v1017_v32, %v3678_v9  ;;  %v1131_v45 = vadd.f32 %v1130_v34, %v3680_v10  ;;  %v1019_v46 = vpop.f32.mrb[45].mxu0  ;;  %v1132_v47 = vpop.f32.mrb[61].mxu1  ;;  %1768 = vmatprep.subr.bf16.mxu0 %v3088_v24 }
 0x2d2   :  { %v1020_v50 = vadd.f32 %v1019_v46, %v3683_v11  ;;  %v1133_v51 = vadd.f32 %v1132_v47, %v3685_v12  ;;  %v1021_v52 = vpop.f32.mrb[46].mxu0  ;;  %v1134_v53 = vpop.f32.mrb[62].mxu1  ;;  %1723 = vmatprep.mubr.bf16.mxu0 %v1228_v42 }
 0x2d3   :  { %v1022_v54 = vadd.f32 %v1021_v52, %v3678_v9  ;;  %v1135_v56 = vadd.f32 %v1134_v53, %v3680_v10  ;;  %v1023_v58 = vpop.f32.mrb[47].mxu0  ;;  %v1136_v59 = vpop.f32.mrb[63].mxu1  ;;  %1724 = vmatmul.mubr.bf16.gmra.mrb[72].mxu0 %v1227_v29  ;;  %v1195_v1 = vmax.f32 %v1018_v37, 0.0  ;;  %v1197_v43 = vmax.f32 %v1131_v45, 0.0  ;;  %v3094_v9 = vld [vmem:[%s4049_s7 + $0x1e4] ss:$8 sps:$4 sm:$0xff]  }
 0x2d4   :  { %v1024_v61 = vadd.f32 %v1023_v58, %v3683_v11  ;;  %v1137_v63 = vadd.f32 %v1136_v59, %v3685_v12  ;;  %1769 = vmatpush1.bf16.msra.mxu0 %v3086_v36  ;;  %v1196_v10 = vmax.f32 %v1020_v50, 0.0  ;;  %v1198_v3 = vmax.f32 %v1133_v51, 0.0  ;;  %v3116_v36 = vld [vmem:[%s4053_s11 + $0x10] sm:$0xff]  }
 0x2d5   :  { %v1199_v44 = vmax.f32 %v1022_v54, 0.0  ;;  %v1201_v2 = vmax.f32 %v1135_v56, 0.0  ;;  %1770 = vmatprep.subr.bf16.mxu0 %v3091_v49 }
 0x2d6   :  { %v1200_v4 = vmax.f32 %v1024_v61, 0.0  ;;  %v1202_v11 = vmax.f32 %v1137_v63, 0.0 }
 0x2d7   :  { %v1231_v5 = vpack.c.bf16 %v1199_v44, %v1195_v1  ;;  %v1233_v12 = vpack.c.bf16 %v1201_v2, %v1197_v43 }
 0x2d8   :  { %v1232_v6 = vpack.c.bf16 %v1200_v4, %v1196_v10  ;;  %v1234_v7 = vpack.c.bf16 %v1202_v11, %v1198_v3  ;;  %1771 = vmatpush1.bf16.msra.mxu0 %v3089_v0 }
 0x2d9   :  { %1772 = vmatprep.subr.bf16.mxu0 %v3094_v9 }
 0x2da   :  { %1733 = vmatprep.mubr.bf16.mxu0 %v1232_v6 }
 0x2db   :  { %1734 = vmatmul.mubr.bf16.gmra.mrb[76].mxu0 %v1231_v5 }
 0x2dc   :  { %1773 = vmatpush1.bf16.msra.mxu0 %v3092_v13  ;;  %1776 = vmatprep.mubr.bf16.mxu0 %v3712_v48  ;;  %v3113_v48 = vld [vmem:[%s4052_s9 + $0x38] sm:$0xff]  }
 0x2dd   :  { %1774 = vmatprep.subr.bf16.mxu0 %v3097_v15 }
 0x2e0   :  { %1775 = vmatpush1.bf16.msra.mxu0 %v3095_v8 }
 0x2e3   :  { %1777 = vmatmul.mubr.bf16.vlgmr.msra.gmra.mrb[48].mxu0 %v3704_v40  ;;  %v3112_v40 = vld [vmem:[%s4052_s9 + $0x78] sm:$0xff]  }
 0x2e4   :  { %1786 = vmatprep.mubr.bf16.mxu0 %v3748_v21  ;;  %2697 = vmatprep.subr.bf16.mxu1 %v3112_v40  ;;  %v1299_v21 = vld [vmem:[%s4054_s8] sm:$0x3] }
 0x2e5   :  { %2698 = vmatpush3.bf16.msra.mxu1 %v3113_v48 }
 0x2eb   :  { %1787 = vmatmul.mubr.bf16.gmra.mrb[52].mxu0 %v3743_v18  ;;  %v3114_v18 = vld [vmem:[%s4053_s11] sm:$0xff]  }
 0x2ec   :  { %1796 = vmatprep.mubr.bf16.mxu0 %v3778_v62  ;;  %2783 = vmatprep.subr.bf16.mxu1 %v3114_v18  ;;  %v3941_v62 = vrot.slane %v1299_v21, %v3536_v41 }
 0x2f3   :  { %1797 = vmatmul.mubr.bf16.gmra.mrb[56].mxu0 %v3776_v60  ;;  %v3938_v60 = vrot.slane %v1299_v21, %v3530_v39 }
 0x2f4   :  { %1806 = vmatprep.mubr.bf16.mxu0 %v3811_v35 }
 0x2fb   :  { %1807 = vmatmul.mubr.bf16.gmra.mrb[60].mxu0 %v3809_v33 }
 0x2fc   :  { %1816 = vmatprep.mubr.bf16.mxu0 %v3835_v16 }
 0x303   :  { %1817 = vmatmul.mubr.bf16.gmra.mrb[64].mxu0 %v3833_v14 }
 0x304   :  { %1826 = vmatprep.mubr.bf16.mxu0 %v3859_v57 }
 0x30b   :  { %1827 = vmatmul.mubr.bf16.gmra.mrb[68].mxu0 %v3857_v55 }
 0x30c   :  { %1836 = vmatprep.mubr.bf16.mxu0 %v1230_v31 }
 0x313   :  { %1837 = vmatmul.mubr.bf16.gmra.mrb[72].mxu0 %v3881_v30 }
 0x314   :  { %1846 = vmatprep.mubr.bf16.mxu0 %v1234_v7 }
 0x31b   :  { %1847 = vmatmul.mubr.bf16.gmra.mrb[76].mxu0 %v1233_v12 }
 0x3b6   :  { %v1778_v33 = vpop.f32.mrb[48].mxu0 }
 0x3b7   :  { %v2815_v35 = vadd.f32 %v1778_v33, %v3938_v60  ;;  %v1780_v14 = vpop.f32.mrb[49].mxu0 }
 0x3b8   :  { %v2816_v16 = vadd.f32 %v1780_v14, %v3941_v62  ;;  %v1782_v55 = vpop.f32.mrb[50].mxu0 }
 0x3b9   :  { %v2817_v57 = vadd.f32 %v1782_v55, %v3938_v60  ;;  %v1784_v17 = vpop.f32.mrb[51].mxu0  ;;  %v1857_v19 = vmax.f32 %v2815_v35, 0.0 }
 0x3ba   :  { %v2818_v38 = vadd.f32 %v1784_v17, %v3941_v62  ;;  %v1858_v22 = vmax.f32 %v2816_v16, 0.0 }
 0x3bb   :  { %v1859_v20 = vmax.f32 %v2817_v57, 0.0 }
 0x3bc   :  { %v1860_v39 = vmax.f32 %v2818_v38, 0.0 }
 0x3bd   :  { %v1889_v23 = vpack.c.bf16 %v1859_v20, %v1857_v19 }
 0x3be   :  { %v1890_v24 = vpack.c.bf16 %v1860_v39, %v1858_v22  ;;  %v1788_v41 = vpop.f32.mrb[52].mxu0 }
 0x3bf   :  { %v2819_v25 = vadd.f32 %v1788_v41, %v3938_v60  ;;  %v1790_v26 = vpop.f32.mrb[53].mxu0 }
 0x3c0   :  { %v2820_v28 = vadd.f32 %v1790_v26, %v3941_v62  ;;  %v1792_v29 = vpop.f32.mrb[54].mxu0  ;;  %2072 = vmatprep.mubr.bf16.mxu1 %v1890_v24 }
 0x3c1   :  { %v2821_v30 = vadd.f32 %v1792_v29, %v3938_v60  ;;  %v1794_v42 = vpop.f32.mrb[55].mxu0  ;;  %2073 = vmatmul.mubr.bf16.vlgmr.msra.gmra.mrb[64].mxu1 %v1889_v23  ;;  %v1861_v32 = vmax.f32 %v2819_v25, 0.0 }
 0x3c2   :  { %v2822_v31 = vadd.f32 %v1794_v42, %v3941_v62  ;;  %2784 = vmatpush3.bf16.msra.mxu1 %v3114_v18  ;;  %v1862_v37 = vmax.f32 %v2820_v28, 0.0 }
 0x3c3   :  { %v1863_v34 = vmax.f32 %v2821_v30, 0.0  ;;  %2785 = vmatprep.subr.bf16.mxu1 %v3115_v27 }
 0x3c4   :  { %v1864_v45 = vmax.f32 %v2822_v31, 0.0 }
 0x3c5   :  { %v1891_v46 = vpack.c.bf16 %v1863_v34, %v1861_v32 }
 0x3c6   :  { %v1892_v47 = vpack.c.bf16 %v1864_v45, %v1862_v37  ;;  %v1798_v49 = vpop.f32.mrb[56].mxu0  ;;  %2786 = vmatpush3.bf16.msra.mxu1 %v3115_v27 }
 0x3c7   :  { %v2823_v50 = vadd.f32 %v1798_v49, %v3938_v60  ;;  %v1800_v51 = vpop.f32.mrb[57].mxu0  ;;  %2787 = vmatprep.subr.bf16.mxu1 %v3116_v36 }
 0x3c8   :  { %v2824_v52 = vadd.f32 %v1800_v51, %v3941_v62  ;;  %v1802_v53 = vpop.f32.mrb[58].mxu0  ;;  %2080 = vmatprep.mubr.bf16.mxu1 %v1892_v47 }
 0x3c9   :  { %v2825_v54 = vadd.f32 %v1802_v53, %v3938_v60  ;;  %v1804_v56 = vpop.f32.mrb[59].mxu0  ;;  %2081 = vmatmul.mubr.bf16.gmra.mrb[68].mxu1 %v1891_v46  ;;  %v1865_v59 = vmax.f32 %v2823_v50, 0.0 }
 0x3ca   :  { %v2826_v58 = vadd.f32 %v1804_v56, %v3941_v62  ;;  %2788 = vmatpush3.bf16.msra.mxu1 %v3116_v36  ;;  %v1866_v63 = vmax.f32 %v2824_v52, 0.0 }
 0x3cb   :  { %v1867_v61 = vmax.f32 %v2825_v54, 0.0 }
 0x3cc   :  { %v1868_v0 = vmax.f32 %v2826_v58, 0.0 }
 0x3cd   :  { %v1893_v1 = vpack.c.bf16 %v1867_v61, %v1865_v59 }
 0x3ce   :  { %v1894_v43 = vpack.c.bf16 %v1868_v0, %v1866_v63  ;;  %v1808_v44 = vpop.f32.mrb[60].mxu0 }
 0x3cf   :  { %v2827_v2 = vadd.f32 %v1808_v44, %v3938_v60  ;;  %v1810_v9 = vpop.f32.mrb[61].mxu0 }
 0x3d0   :  { %v2828_v10 = vadd.f32 %v1810_v9, %v3941_v62  ;;  %v1812_v3 = vpop.f32.mrb[62].mxu0  ;;  %2088 = vmatprep.mubr.bf16.mxu1 %v1894_v43 }
 0x3d1   :  { %v2829_v4 = vadd.f32 %v1812_v3, %v3938_v60  ;;  %v1814_v11 = vpop.f32.mrb[63].mxu0  ;;  %2089 = vmatmul.mubr.bf16.gmra.mrb[72].mxu1 %v1893_v1  ;;  %v1869_v12 = vmax.f32 %v2827_v2, 0.0 }
 0x3d2   :  { %v2830_v5 = vadd.f32 %v1814_v11, %v3941_v62  ;;  %v1870_v7 = vmax.f32 %v2828_v10, 0.0 }
 0x3d3   :  { %v1871_v6 = vmax.f32 %v2829_v4, 0.0 }
 0x3d4   :  { %v1872_v13 = vmax.f32 %v2830_v5, 0.0 }
 0x3d5   :  { %v1895_v15 = vpack.c.bf16 %v1871_v6, %v1869_v12  ;;  %v3117_v12 = vld [vmem:[%s4053_s11 + $0x18] sm:$0xff]   ;;  %v3120_v6 = vld [vmem:[%s4053_s11 + $0x30] sm:$0xff]  }
 0x3d6   :  { %v1896_v8 = vpack.c.bf16 %v1872_v13, %v1870_v7  ;;  %v1818_v40 = vpop.f32.mrb[64].mxu0  ;;  %2789 = vmatprep.subr.bf16.mxu1 %v3117_v12  ;;  %v3121_v7 = vld [vmem:[%s4053_s11 + $0x38] sm:$0xff]  }
 0x3d7   :  { %v2831_v48 = vadd.f32 %v1818_v40, %v3938_v60  ;;  %v1820_v18 = vpop.f32.mrb[65].mxu0  ;;  %2790 = vmatpush3.bf16.msra.mxu1 %v3117_v12 }
 0x3d8   :  { %v2832_v21 = vadd.f32 %v1820_v18, %v3941_v62  ;;  %v1822_v33 = vpop.f32.mrb[66].mxu0  ;;  %2096 = vmatprep.mubr.bf16.mxu1 %v1896_v8 }
 0x3d9   :  { %v2833_v35 = vadd.f32 %v1822_v33, %v3938_v60  ;;  %v1824_v14 = vpop.f32.mrb[67].mxu0  ;;  %2097 = vmatmul.mubr.bf16.gmra.mrb[76].mxu1 %v1895_v15  ;;  %v1873_v55 = vmax.f32 %v2831_v48, 0.0  ;;  %v3999_v15 = vld [vmem:[%s4055_s10] ss:$0 sm:$0xff] }
 0x3da   :  { %v2834_v16 = vadd.f32 %v1824_v14, %v3941_v62  ;;  %v1874_v17 = vmax.f32 %v2832_v21, 0.0 }
 0x3db   :  { %v1875_v57 = vmax.f32 %v2833_v35, 0.0 }
 0x3dc   :  { %v1876_v38 = vmax.f32 %v2834_v16, 0.0 }
 0x3dd   :  { %v1897_v19 = vpack.c.bf16 %v1875_v57, %v1873_v55 }
 0x3de   :  { %v1898_v20 = vpack.c.bf16 %v1876_v38, %v1874_v17  ;;  %v1828_v22 = vpop.f32.mrb[68].mxu0 }
 0x3df   :  { %v2835_v39 = vadd.f32 %v1828_v22, %v3938_v60  ;;  %v1830_v23 = vpop.f32.mrb[69].mxu0 }
 0x3e0   :  { %v2836_v24 = vadd.f32 %v1830_v23, %v3941_v62  ;;  %v1832_v41 = vpop.f32.mrb[70].mxu0  ;;  %2104 = vmatprep.mubr.bf16.mxu1 %v1898_v20 }
 0x3e1   :  { %v2837_v25 = vadd.f32 %v1832_v41, %v3938_v60  ;;  %v1834_v26 = vpop.f32.mrb[71].mxu0  ;;  %2105 = vmatmul.mubr.bf16.gmra.mrb[80].mxu1 %v1897_v19  ;;  %v1877_v28 = vmax.f32 %v2835_v39, 0.0 }
 0x3e2   :  { %v2838_v27 = vadd.f32 %v1834_v26, %v3941_v62  ;;  %v1878_v30 = vmax.f32 %v2836_v24, 0.0 }
 0x3e3   :  { %v1879_v29 = vmax.f32 %v2837_v25, 0.0 }
 0x3e4   :  { %v1880_v42 = vmax.f32 %v2838_v27, 0.0 }
 0x3e5   :  { %v1899_v31 = vpack.c.bf16 %v1879_v29, %v1877_v28 }
 0x3e6   :  { %v1900_v32 = vpack.c.bf16 %v1880_v42, %v1878_v30  ;;  %v1838_v34 = vpop.f32.mrb[72].mxu0 }
 0x3e7   :  { %v2839_v36 = vadd.f32 %v1838_v34, %v3938_v60  ;;  %v1840_v37 = vpop.f32.mrb[73].mxu0 }
 0x3e8   :  { %v2840_v45 = vadd.f32 %v1840_v37, %v3941_v62  ;;  %v1842_v46 = vpop.f32.mrb[74].mxu0  ;;  %2112 = vmatprep.mubr.bf16.mxu1 %v1900_v32 }
 0x3e9   :  { %v2841_v47 = vadd.f32 %v1842_v46, %v3938_v60  ;;  %v1844_v49 = vpop.f32.mrb[75].mxu0  ;;  %2113 = vmatmul.mubr.bf16.gmra.mrb[84].mxu1 %v1899_v31  ;;  %v1881_v51 = vmax.f32 %v2839_v36, 0.0 }
 0x3ea   :  { %v2842_v50 = vadd.f32 %v1844_v49, %v3941_v62  ;;  %v1882_v53 = vmax.f32 %v2840_v45, 0.0 }
 0x3eb   :  { %v1883_v52 = vmax.f32 %v2841_v47, 0.0 }
 0x3ec   :  { %v1884_v54 = vmax.f32 %v2842_v50, 0.0 }
 0x3ed   :  { %v1901_v56 = vpack.c.bf16 %v1883_v52, %v1881_v51 }
 0x3ee   :  { %v1902_v58 = vpack.c.bf16 %v1884_v54, %v1882_v53  ;;  %v1848_v59 = vpop.f32.mrb[76].mxu0 }
 0x3ef   :  { %v2843_v61 = vadd.f32 %v1848_v59, %v3938_v60  ;;  %v1850_v63 = vpop.f32.mrb[77].mxu0 }
 0x3f0   :  { %v2844_v0 = vadd.f32 %v1850_v63, %v3941_v62  ;;  %v1852_v1 = vpop.f32.mrb[78].mxu0  ;;  %2120 = vmatprep.mubr.bf16.mxu1 %v1902_v58 }
 0x3f1   :  { %v2845_v43 = vadd.f32 %v1852_v1, %v3938_v60  ;;  %v1854_v44 = vpop.f32.mrb[79].mxu0  ;;  %2121 = vmatmul.mubr.bf16.gmra.mrb[88].mxu1 %v1901_v56  ;;  %v1885_v9 = vmax.f32 %v2843_v61, 0.0  ;;  %v3118_v60 = vld [vmem:[%s4053_s11 + $0x20] sm:$0xff]  }
 0x3f2   :  { %v2846_v2 = vadd.f32 %v1854_v44, %v3941_v62  ;;  %v1886_v3 = vmax.f32 %v2844_v0, 0.0  ;;  %2791 = vmatprep.subr.bf16.mxu1 %v3118_v60  ;;  %v3119_v62 = vld [vmem:[%s4053_s11 + $0x28] sm:$0xff]  }
 0x3f3   :  { %v1887_v10 = vmax.f32 %v2845_v43, 0.0  ;;  %2792 = vmatpush3.bf16.msra.mxu1 %v3118_v60 }
 0x3f4   :  { %v1888_v4 = vmax.f32 %v2846_v2, 0.0  ;;  %2793 = vmatprep.subr.bf16.mxu1 %v3119_v62 }
 0x3f5   :  { %v1903_v11 = vpack.c.bf16 %v1887_v10, %v1885_v9 }
 0x3f6   :  { %v1904_v5 = vpack.c.bf16 %v1888_v4, %v1886_v3 }
 0x3f7   :  { %2794 = vmatpush3.bf16.msra.mxu1 %v3119_v62 }
 0x3f8   :  { %2128 = vmatprep.mubr.bf16.mxu1 %v1904_v5  ;;  %2795 = vmatprep.subr.bf16.mxu1 %v3120_v6 }
 0x3f9   :  { %2129 = vmatmul.mubr.bf16.gmra.mrb[92].mxu1 %v1903_v11 }
 0x3fb   :  { %2796 = vmatpush3.bf16.msra.mxu1 %v3120_v6 }
 0x3fc   :  { %2797 = vmatprep.subr.bf16.mxu1 %v3121_v7 }
 0x3ff   :  { %2798 = vmatpush3.bf16.msra.mxu1 %v3121_v7 }
 0x494   :  { %v2699_v13 = vpop.f32.mrb[64].mxu1 }
 0x495   :  { %v2700_v8 = vpop.f32.mrb[65].mxu1 }
 0x496   :  { %v2701_v40 = vadd.f32 %v2700_v8, %v2699_v13  ;;  %v2702_v48 = vpop.f32.mrb[66].mxu1 }
 0x497   :  { %v2703_v18 = vpop.f32.mrb[67].mxu1 }
 0x498   :  { %v2075_v21 = vadd.f32 %v2701_v40, %v3999_v15  ;;  %v2704_v33 = vadd.f32 %v2703_v18, %v2702_v48 }
 0x49a   :  { %v2078_v35 = vadd.f32 %v2704_v33, %v3999_v15  ;;  %v2137_v14 = vmax.f32 %v2075_v21, 0.0 }
 0x49c   :  { %v2138_v16 = vmax.f32 %v2078_v35, 0.0  ;;  %v2705_v55 = vpop.f32.mrb[68].mxu1 }
 0x49d   :  { %v2706_v57 = vpop.f32.mrb[69].mxu1 }
 0x49e   :  { %v2707_v17 = vadd.f32 %v2706_v57, %v2705_v55  ;;  %v2708_v38 = vpop.f32.mrb[70].mxu1  ;;  %v2153_v19 = vpack.c.bf16 %v2138_v16, %v2137_v14 }
 0x49f   :  { %v2709_v20 = vpop.f32.mrb[71].mxu1 }
 0x4a0   :  { %v2083_v22 = vadd.f32 %v2707_v17, %v3999_v15  ;;  %v2710_v39 = vadd.f32 %v2709_v20, %v2708_v38  ;;  %2799 = vmatprep.mubr.bf16.mxu1 %v2153_v19 }
 0x4a2   :  { %v2086_v23 = vadd.f32 %v2710_v39, %v3999_v15  ;;  %v2139_v24 = vmax.f32 %v2083_v22, 0.0 }
 0x4a4   :  { %v2140_v41 = vmax.f32 %v2086_v23, 0.0  ;;  %v2711_v25 = vpop.f32.mrb[72].mxu1 }
 0x4a5   :  { %v2712_v26 = vpop.f32.mrb[73].mxu1 }
 0x4a6   :  { %v2154_v27 = vpack.c.bf16 %v2140_v41, %v2139_v24  ;;  %v2713_v28 = vadd.f32 %v2712_v26, %v2711_v25  ;;  %v2714_v29 = vpop.f32.mrb[74].mxu1 }
 0x4a7   :  { %v2715_v30 = vpop.f32.mrb[75].mxu1 }
 0x4a8   :  { %v2091_v42 = vadd.f32 %v2713_v28, %v3999_v15  ;;  %v2716_v31 = vadd.f32 %v2715_v30, %v2714_v29  ;;  %2800 = vmatmul.mubr.bf16.vlgmr.msra.gmra.mrb[96].mxu1 %v2154_v27  ;;  %v2585_v30 = vld [vmem:[%s4056_s12] ss:$0 sm:$0xff] }
 0x4aa   :  { %v2094_v32 = vadd.f32 %v2716_v31, %v3999_v15  ;;  %v2141_v34 = vmax.f32 %v2091_v42, 0.0 }
 0x4ac   :  { %v2142_v36 = vmax.f32 %v2094_v32, 0.0  ;;  %v2717_v37 = vpop.f32.mrb[76].mxu1 }
 0x4ad   :  { %v2718_v45 = vpop.f32.mrb[77].mxu1 }
 0x4ae   :  { %v2719_v46 = vadd.f32 %v2718_v45, %v2717_v37  ;;  %v2720_v47 = vpop.f32.mrb[78].mxu1  ;;  %v2155_v49 = vpack.c.bf16 %v2142_v36, %v2141_v34 }
 0x4af   :  { %v2721_v50 = vpop.f32.mrb[79].mxu1 }
 0x4b0   :  { %v2099_v51 = vadd.f32 %v2719_v46, %v3999_v15  ;;  %v2722_v52 = vadd.f32 %v2721_v50, %v2720_v47  ;;  %2803 = vmatprep.mubr.bf16.mxu1 %v2155_v49 }
 0x4b2   :  { %v2102_v53 = vadd.f32 %v2722_v52, %v3999_v15  ;;  %v2143_v54 = vmax.f32 %v2099_v51, 0.0 }
 0x4b4   :  { %v2144_v56 = vmax.f32 %v2102_v53, 0.0  ;;  %v2723_v58 = vpop.f32.mrb[80].mxu1 }
 0x4b5   :  { %v2724_v59 = vpop.f32.mrb[81].mxu1 }
 0x4b6   :  { %v2725_v61 = vadd.f32 %v2724_v59, %v2723_v58  ;;  %v2726_v63 = vpop.f32.mrb[82].mxu1  ;;  %v2156_v0 = vpack.c.bf16 %v2144_v56, %v2143_v54 }
 0x4b7   :  { %v2727_v1 = vpop.f32.mrb[83].mxu1 }
 0x4b8   :  { %v2107_v43 = vadd.f32 %v2725_v61, %v3999_v15  ;;  %v2728_v44 = vadd.f32 %v2727_v1, %v2726_v63  ;;  %2804 = vmatmul.mubr.bf16.gmra.mrb[100].mxu1 %v2156_v0 }
 0x4ba   :  { %v2110_v2 = vadd.f32 %v2728_v44, %v3999_v15  ;;  %v2145_v9 = vmax.f32 %v2107_v43, 0.0 }
 0x4bc   :  { %v2146_v10 = vmax.f32 %v2110_v2, 0.0  ;;  %v2729_v3 = vpop.f32.mrb[84].mxu1 }
 0x4bd   :  { %v2730_v4 = vpop.f32.mrb[85].mxu1 }
 0x4be   :  { %v2731_v11 = vadd.f32 %v2730_v4, %v2729_v3  ;;  %v2732_v5 = vpop.f32.mrb[86].mxu1  ;;  %v2157_v12 = vpack.c.bf16 %v2146_v10, %v2145_v9 }
 0x4bf   :  { %v2733_v60 = vpop.f32.mrb[87].mxu1 }
 0x4c0   :  { %v2115_v62 = vadd.f32 %v2731_v11, %v3999_v15  ;;  %v2734_v6 = vadd.f32 %v2733_v60, %v2732_v5  ;;  %2807 = vmatprep.mubr.bf16.mxu1 %v2157_v12 }
 0x4c2   :  { %v2118_v7 = vadd.f32 %v2734_v6, %v3999_v15  ;;  %v2147_v13 = vmax.f32 %v2115_v62, 0.0 }
 0x4c4   :  { %v2148_v8 = vmax.f32 %v2118_v7, 0.0  ;;  %v2735_v40 = vpop.f32.mrb[88].mxu1 }
 0x4c5   :  { %v2736_v48 = vpop.f32.mrb[89].mxu1 }
 0x4c6   :  { %v2737_v18 = vadd.f32 %v2736_v48, %v2735_v40  ;;  %v2738_v21 = vpop.f32.mrb[90].mxu1  ;;  %v2158_v33 = vpack.c.bf16 %v2148_v8, %v2147_v13 }
 0x4c7   :  { %v2739_v35 = vpop.f32.mrb[91].mxu1 }
 0x4c8   :  { %v2123_v14 = vadd.f32 %v2737_v18, %v3999_v15  ;;  %v2740_v16 = vadd.f32 %v2739_v35, %v2738_v21  ;;  %2808 = vmatmul.mubr.bf16.gmra.mrb[104].mxu1 %v2158_v33 }
 0x4ca   :  { %v2126_v55 = vadd.f32 %v2740_v16, %v3999_v15  ;;  %v2149_v57 = vmax.f32 %v2123_v14, 0.0 }
 0x4cc   :  { %v2150_v17 = vmax.f32 %v2126_v55, 0.0  ;;  %v2741_v38 = vpop.f32.mrb[92].mxu1 }
 0x4cd   :  { %v2742_v19 = vpop.f32.mrb[93].mxu1 }
 0x4ce   :  { %v2743_v20 = vadd.f32 %v2742_v19, %v2741_v38  ;;  %v2744_v22 = vpop.f32.mrb[94].mxu1  ;;  %v2159_v39 = vpack.c.bf16 %v2150_v17, %v2149_v57 }
 0x4cf   :  { %v2745_v23 = vpop.f32.mrb[95].mxu1 }
 0x4d0   :  { %v2131_v24 = vadd.f32 %v2743_v20, %v3999_v15  ;;  %v2746_v41 = vadd.f32 %v2745_v23, %v2744_v22  ;;  %2811 = vmatprep.mubr.bf16.mxu1 %v2159_v39 }
 0x4d2   :  { %v2134_v25 = vadd.f32 %v2746_v41, %v3999_v15  ;;  %v2151_v26 = vmax.f32 %v2131_v24, 0.0 }
 0x4d4   :  { %v2152_v27 = vmax.f32 %v2134_v25, 0.0 }
 0x4d6   :  { %v2160_v28 = vpack.c.bf16 %v2152_v27, %v2151_v26 }
 0x4d8   :  { %2812 = vmatmul.mubr.bf16.gmra.mrb[108].mxu1 %v2160_v28 }
 0x57b   :  { %v2801_v29 = vpop.f32.mrb[96].mxu1 }
 0x57c   :  { %v2266_v42 = vpop.f32.mrb[97].mxu1  ;;  %v2275_v32 = vadd.f32 %v2801_v29, %v2585_v30 }
 0x57d   :  { %v2802_v31 = vpop.f32.mrb[98].mxu1  ;;  %v2267_v37 = vadd.f32 %v2585_v30, %v2266_v42 }
 0x57e   :  { %v2278_v34 = vadd.f32 %v2802_v31, %v2585_v30  ;;  %v2269_v36 = vpop.f32.mrb[99].mxu1 }
 0x57f   :  { %v2270_v45 = vadd.f32 %v2585_v30, %v2269_v36 }
 0x580   :  { %v2634_v46 = vpack.c.bf16 %v2278_v34, %v2275_v32 }
 0x581   :  { %v2629_v47 = vpack.c.bf16 %v2270_v45, %v2267_v37 }
 0x582   :  { %2666 = vst [vmem:[%s4057_s13 + $0x8] sm:$0xff] %v2634_v46  }
 0x583   :  { %2630 = vst [vmem:[%s4057_s13] sm:$0xff] %v2629_v47  }
 0x58b   :  { %v2805_v15 = vpop.f32.mrb[100].mxu1 }
 0x58c   :  { %v2282_v49 = vpop.f32.mrb[101].mxu1  ;;  %v2291_v51 = vadd.f32 %v2805_v15, %v2585_v30 }
 0x58d   :  { %v2806_v50 = vpop.f32.mrb[102].mxu1  ;;  %v2283_v54 = vadd.f32 %v2585_v30, %v2282_v49 }
 0x58e   :  { %v2294_v52 = vadd.f32 %v2806_v50, %v2585_v30  ;;  %v2285_v53 = vpop.f32.mrb[103].mxu1 }
 0x58f   :  { %v2286_v56 = vadd.f32 %v2585_v30, %v2285_v53 }
 0x590   :  { %v2644_v58 = vpack.c.bf16 %v2294_v52, %v2291_v51 }
 0x591   :  { %v2639_v59 = vpack.c.bf16 %v2286_v56, %v2283_v54 }
 0x592   :  { %2668 = vst [vmem:[%s4057_s13 + $0x18] sm:$0xff] %v2644_v58  }
 0x593   :  { %2667 = vst [vmem:[%s4057_s13 + $0x10] sm:$0xff] %v2639_v59  }
 0x59b   :  { %v2809_v61 = vpop.f32.mrb[104].mxu1 }
 0x59c   :  { %v2298_v63 = vpop.f32.mrb[105].mxu1  ;;  %v2307_v1 = vadd.f32 %v2809_v61, %v2585_v30 }
 0x59d   :  { %v2810_v0 = vpop.f32.mrb[106].mxu1  ;;  %v2299_v2 = vadd.f32 %v2585_v30, %v2298_v63 }
 0x59e   :  { %v2310_v43 = vadd.f32 %v2810_v0, %v2585_v30  ;;  %v2301_v44 = vpop.f32.mrb[107].mxu1 }
 0x59f   :  { %v2302_v9 = vadd.f32 %v2585_v30, %v2301_v44 }
 0x5a0   :  { %v2654_v10 = vpack.c.bf16 %v2310_v43, %v2307_v1 }
 0x5a1   :  { %v2649_v3 = vpack.c.bf16 %v2302_v9, %v2299_v2 }
 0x5a2   :  { %2670 = vst [vmem:[%s4057_s13 + $0x28] sm:$0xff] %v2654_v10  }
 0x5a3   :  { %2669 = vst [vmem:[%s4057_s13 + $0x20] sm:$0xff] %v2649_v3  }
 0x5ab   :  { %v2813_v4 = vpop.f32.mrb[108].mxu1 }
 0x5ac   :  { %v2314_v11 = vpop.f32.mrb[109].mxu1  ;;  %v2323_v12 = vadd.f32 %v2813_v4, %v2585_v30 }
 0x5ad   :  { %v2814_v5 = vpop.f32.mrb[110].mxu1  ;;  %v2315_v6 = vadd.f32 %v2585_v30, %v2314_v11 }
 0x5ae   :  { %v2326_v60 = vadd.f32 %v2814_v5, %v2585_v30  ;;  %v2317_v62 = vpop.f32.mrb[111].mxu1 }
 0x5af   :  { %v2318_v7 = vadd.f32 %v2585_v30, %v2317_v62 }
 0x5b0   :  { %v2664_v13 = vpack.c.bf16 %v2326_v60, %v2323_v12 }
 0x5b1   :  { %v2659_v8 = vpack.c.bf16 %v2318_v7, %v2315_v6 }
 0x5b2   :  { %2672 = vst [vmem:[%s4057_s13 + $0x38] sm:$0xff] %v2664_v13  }
 0x5b3   :  { %2671 = vst [vmem:[%s4057_s13 + $0x30] sm:$0xff] %v2659_v8  }

</bundles_post_ra>
